<compile_context>
chip_gen: v7x
topology: tpu7x:2x2x1
jax: 0.10.0
libtpu: 0.0.40
codegen_flags: <defaults>
</compile_context>

<pallas_src>
import functools
import math

import jax
import jax.numpy as jnp
from jax.experimental import pallas as pl
from jax.experimental.pallas import tpu as pltpu


def _round_up(x: int, m: int) -> int:
    return ((x + m - 1) // m) * m


def _pick_block_batch(n: int, seq_len: int, target_rows: int = 512,
                      min_grid_steps: int = 1) -> int:
    """Largest divisor TB of n with TB*seq_len <= target_rows.

    min_grid_steps=2 only helps on v7x (two TensorCores split the grid under
    dimension_semantics=("parallel",)); on single-TC v5e/v6e forcing extra
    steps only adds per-step pipeline overhead, so the default is 1.
    """
    tb = max(1, min(n, target_rows // max(seq_len, 1)))
    while n % tb:
        tb -= 1
    while n // tb < min_grid_steps and tb > 1:
        tb -= 1
        while n % tb:
            tb -= 1
    return tb


# -----------------------------------------------------------------------------
# Pallas kernel: attention pooling for a block of TB batch elements.
# -----------------------------------------------------------------------------
def _attn_pool_kernel(x_ref, pos_ref, wqkv_ref, bqkv_ref, wo_ref, bo_ref,
                      y_ref, att_ref, *, num_heads: int, head_dim: int,
                      seq_pad: int):
    TB, C, HW = x_ref.shape
    L = HW + 1
    out_pad = y_ref.shape[-1]

    # --- prologue: on-chip (C, HW)->(HW, C) transpose, mean token, pos add ---
    # Minor-two-dims transpose lowers to the XLU; fp32 math here is cheap and
    # replaces the wrapper-side transpose/cast HBM passes.
    xb = jnp.transpose(x_ref[...], (0, 2, 1)).astype(jnp.float32)   # (TB,HW,C)
    mean_tok = jnp.mean(xb, axis=1, keepdims=True)                  # (TB,1,C)
    xt = jnp.concatenate([mean_tok, xb], axis=1)                    # (TB,L,C)
    xt = xt + pos_ref[...].astype(jnp.float32)[None, :, :]

    # --- fused QKV projection: one (TB*L, C) x (C, 3C) MXU matmul -------------
    # Single downcast feeds the MXU on the bf16 path (no fp32 round-trip).
    xf = xt.reshape(TB * L, C).astype(wqkv_ref.dtype)
    qkv = jnp.dot(xf, wqkv_ref[...],
                  preferred_element_type=jnp.float32) + bqkv_ref[...]
    qkv3 = qkv.reshape(TB, L, 3 * C)                                # fp32

    # --- per-head attention, batched over the TB block elements ---------------
    # Scores/softmax stay fp32 (VPU/EUP); each head's context is folded
    # straight into the output projection (no head-output lane concat).
    att_acc = jnp.zeros((TB, L, L), jnp.float32)
    y_acc = jnp.zeros((TB * L, out_pad), jnp.float32)
    for h in range(num_heads):                                      # static
        lo = h * head_dim
        q_h = qkv3[:, :, lo:lo + head_dim]
        k_h = qkv3[:, :, C + lo:C + lo + head_dim]
        v_h = qkv3[:, :, 2 * C + lo:2 * C + lo + head_dim]

        s = jnp.einsum('bqd,bkd->bqk', q_h, k_h,
                       preferred_element_type=jnp.float32)          # (TB,L,L)
        s = s - jnp.max(s, axis=-1, keepdims=True)
        p = jnp.exp(s)
        p = p * pl.reciprocal(jnp.sum(p, axis=-1, keepdims=True), approx=True)
        att_acc = att_acc + p

        ctx = jnp.einsum('bqk,bkd->bqd', p, v_h,
                         preferred_element_type=jnp.float32)        # (TB,L,hd)
        y_acc = y_acc + jnp.dot(
            ctx.reshape(TB * L, head_dim).astype(wo_ref.dtype),
            wo_ref[lo:lo + head_dim, :],                            # sublane slice
            preferred_element_type=jnp.float32)

    # --- outputs: y in compute dtype; att downcast (bf16 by default) before
    # the lane padding so the pad copy and HBM writeback are halved.
    y = y_acc + bo_ref[...]
    y_ref[...] = y.reshape(TB, L, out_pad).astype(y_ref.dtype)

    att = (att_acc * (1.0 / num_heads)).astype(att_ref.dtype)
    if seq_pad > L:
        att = jnp.concatenate(
            [att, jnp.zeros((TB, L, seq_pad - L), att_ref.dtype)], axis=-1)
    att_ref[...] = att


# -----------------------------------------------------------------------------
# One-time parameter fusion (hoisted out of the per-call path).
# -----------------------------------------------------------------------------
def fuse_params(params, num_heads, *, compute_dtype=jnp.float32):
    embed_dim = params["q_w"].shape[0]
    out_dim = params["c_w"].shape[0]
    assert embed_dim % num_heads == 0
    head_dim = embed_dim // num_heads
    scale = 1.0 / math.sqrt(head_dim)

    # Fused QKV weight with the attention scale folded into the Q part.
    wqkv = jnp.concatenate(
        [params["q_w"].T * scale, params["k_w"].T, params["v_w"].T],
        axis=1).astype(compute_dtype)                               # (C, 3C)
    bqkv = jnp.concatenate(
        [params["q_b"] * scale, params["k_b"], params["v_b"]]
    ).astype(jnp.float32).reshape(1, 3 * embed_dim)

    # Pad the output projection to a 128-lane multiple -> unmasked stores.
    out_pad = _round_up(out_dim, 128)
    wo = params["c_w"].T                                            # (C, out)
    bo = params["c_b"]
    if out_pad > out_dim:
        wo = jnp.pad(wo, ((0, 0), (0, out_pad - out_dim)))
        bo = jnp.pad(bo, (0, out_pad - out_dim))
    return {
        "pos": params["pos_emb"].astype(jnp.float32),               # (L, C)
        "wqkv": wqkv,
        "bqkv": bqkv,
        "wo": wo.astype(compute_dtype),                             # (C, out_pad)
        "bo": bo.astype(jnp.float32).reshape(1, out_pad),
    }


# -----------------------------------------------------------------------------
# Full AttentionPool2d forward (thin XLA glue, attention in Pallas).
# -----------------------------------------------------------------------------
def attention_pool2d(x_nchw, fused, *, num_heads, out_dim,
                     att_dtype=jnp.bfloat16, block_batch=None,
                     target_rows=512, min_grid_steps=1):
    N, C, H, W = x_nchw.shape
    HW = H * W
    L = HW + 1
    assert C % num_heads == 0
    head_dim = C // num_heads
    out_pad = fused["wo"].shape[1]
    seq_pad = _round_up(L, 128)
    compute_dtype = fused["wqkv"].dtype
    y_dtype = compute_dtype                    # emit y in compute dtype

    # (N, C, H, W) -> (N, C, HW) is a free reshape; the token transpose,
    # mean token and pos-emb add all happen inside the kernel.
    x_tok = x_nchw.reshape(N, C, HW)

    TB = block_batch or _pick_block_batch(N, L, target_rows, min_grid_steps)
    assert N % TB == 0
    grid = (N // TB,)

    # --- VMEM budget: single-buffered weights + double-buffered blocks +
    # fp32 intermediates; capped at 64 MiB so it also fits v7x.
    w_item = jnp.dtype(compute_dtype).itemsize
    x_item = jnp.dtype(x_nchw.dtype).itemsize
    y_item = jnp.dtype(y_dtype).itemsize
    a_item = jnp.dtype(att_dtype).itemsize
    weight_bytes = ((C * 3 * C + C * out_pad) * w_item
                    + (3 * C + out_pad + L * C) * 4)
    block_bytes = 2 * TB * (C * HW * x_item + L * out_pad * y_item
                            + L * seq_pad * a_item)
    interm_bytes = TB * L * (4 * C + out_pad + 2 * L) * 4
    vmem_limit = int(min(64 * 2 ** 20,
                         max(32 * 2 ** 20,
                             2 * (weight_bytes + block_bytes + interm_bytes))))

    flops = int(N * (2 * L * C * (3 * C + out_pad) + 4 * L * L * C))
    transcendentals = int(N * num_heads * L * L)
    bytes_accessed = int(N * C * HW * x_item + weight_bytes
                         + N * L * (out_pad * y_item + seq_pad * a_item))

    kernel = functools.partial(_attn_pool_kernel, num_heads=num_heads,
                               head_dim=head_dim, seq_pad=seq_pad)

    const = dict(pipeline_mode=pl.Buffered(1))   # grid-invariant -> 1 buffer
    y_pad, att_pad = pl.pallas_call(
        kernel,
        grid=grid,
        in_specs=[
            pl.BlockSpec((TB, C, HW), lambda b: (b, 0, 0)),          # x block
            pl.BlockSpec((L, C), lambda b: (0, 0), **const),         # pos emb
            pl.BlockSpec((C, 3 * C), lambda b: (0, 0), **const),     # QKV weight
            pl.BlockSpec((1, 3 * C), lambda b: (0, 0), **const),     # QKV bias
            pl.BlockSpec((C, out_pad), lambda b: (0, 0), **const),   # out weight
            pl.BlockSpec((1, out_pad), lambda b: (0, 0), **const),   # out bias
        ],
        out_specs=[
            pl.BlockSpec((TB, L, out_pad), lambda b: (b, 0, 0)),
            pl.BlockSpec((TB, L, seq_pad), lambda b: (b, 0, 0)),
        ],
        out_shape=[
            jax.ShapeDtypeStruct((N, L, out_pad), y_dtype),
            jax.ShapeDtypeStruct((N, L, seq_pad), att_dtype),
        ],
        compiler_params=pltpu.CompilerParams(
            dimension_semantics=("parallel",),
            vmem_limit_bytes=vmem_limit),
        cost_estimate=pl.CostEstimate(flops=flops,
                                      transcendentals=transcendentals,
                                      bytes_accessed=bytes_accessed),
    )(x_tok, fused["pos"], fused["wqkv"], fused["bqkv"],
      fused["wo"], fused["bo"])

    y = y_pad[:, :, :out_dim]                       # crop lane padding
    pooled = y[:, 0, :]                             # x[0]         -> (N, OUT)
    tokens = y[:, 1:, :].transpose(1, 0, 2)         # x[1:]        -> (HW, N, OUT)
    att = att_pad[:, 1:, 1:L]                       # att[:,1:,1:] -> (N, HW, HW)
    # TODO(synk): emitting y directly in (L, N, OUT) layout would need a
    # non-minor in-kernel transpose; the tokens transpose stays in XLA.
    return pooled, tokens, att


# -----------------------------------------------------------------------------
# Pure-JAX reference (mirrors F.multi_head_attention_forward) for verification.
# -----------------------------------------------------------------------------
def _reference(x_nchw, params, num_heads):
    N, C, H, W = x_nchw.shape
    hw = H * W
    x = x_nchw.reshape(N, C, hw).transpose(2, 0, 1)
    x = jnp.concatenate([jnp.mean(x, axis=0, keepdims=True), x], axis=0)
    x = x + params["pos_emb"][:, None, :]
    L = x.shape[0]
    hd = C // num_heads

    q = x @ params["q_w"].T + params["q_b"]
    k = x @ params["k_w"].T + params["k_b"]
    v = x @ params["v_w"].T + params["v_b"]
    q = q * (hd ** -0.5)

    def split(t):  # (L, N, C) -> (N*nh, L, hd)
        return t.reshape(L, N * num_heads, hd).transpose(1, 0, 2)

    qh, kh, vh = split(q), split(k), split(v)
    s = jnp.einsum("bld,bmd->blm", qh, kh)
    p = jax.nn.softmax(s, axis=-1)
    o = jnp.einsum("blm,bmd->bld", p, vh)               # (N*nh, L, hd)
    o = o.transpose(1, 0, 2).reshape(L, N, C)
    y = o @ params["c_w"].T + params["c_b"]             # (L, N, OUT)
    att = p.reshape(N, num_heads, L, L).mean(axis=1)    # (N, L, L)
    return y[0], y[1:], att[:, 1:, 1:]


# -----------------------------------------------------------------------------
# Deterministic parameter init + driver.
# -----------------------------------------------------------------------------
def init_params(key, spacial_dim, embed_dim, output_dim):
    L = spacial_dim ** 2 + 1
    ks = jax.random.split(key, 9)
    return {
        "pos_emb": jax.random.normal(ks[0], (L, embed_dim), jnp.float32)
                   / (embed_dim ** 0.5),
        "q_w": jax.random.normal(ks[1], (embed_dim, embed_dim), jnp.float32) * 0.05,
        "q_b": jax.random.normal(ks[2], (embed_dim,), jnp.float32) * 0.05,
        "k_w": jax.random.normal(ks[3], (embed_dim, embed_dim), jnp.float32) * 0.05,
        "k_b": jax.random.normal(ks[4], (embed_dim,), jnp.float32) * 0.05,
        "v_w": jax.random.normal(ks[5], (embed_dim, embed_dim), jnp.float32) * 0.05,
        "v_b": jax.random.normal(ks[6], (embed_dim,), jnp.float32) * 0.05,
        "c_w": jax.random.normal(ks[7], (output_dim, embed_dim), jnp.float32) * 0.05,
        "c_b": jax.random.normal(ks[8], (output_dim,), jnp.float32) * 0.05,
    }


if __name__ == "__main__":
    batch = 2
    spacial_dim = 4          # HW = 16, L = 17
    embed_dim = 32
    num_heads = 4
    output_dim = 16

    key = jax.random.PRNGKey(0)
    pkey, xkey = jax.random.split(key)
    params = init_params(pkey, spacial_dim, embed_dim, output_dim)
    x = jax.random.normal(
        xkey, (batch, embed_dim, spacial_dim, spacial_dim), jnp.float32)

    r_pooled, r_tokens, r_att = _reference(x, params, num_heads)

    fwd = jax.jit(functools.partial(attention_pool2d, num_heads=num_heads,
                                    out_dim=output_dim))

    # fp32 operand path (att is emitted in bf16 -> slightly looser att tol).
    fused32 = fuse_params(params, num_heads, compute_dtype=jnp.float32)
    pooled, tokens, att = fwd(x, fused32)
    jax.block_until_ready((pooled, tokens, att))

    assert pooled.shape == (batch, output_dim)
    assert tokens.shape == (spacial_dim ** 2, batch, output_dim)
    assert att.shape == (batch, spacial_dim ** 2, spacial_dim ** 2)
    assert jnp.allclose(pooled, r_pooled, atol=5e-3, rtol=5e-3)
    assert jnp.allclose(tokens, r_tokens, atol=5e-3, rtol=5e-3)
    assert jnp.allclose(att.astype(jnp.float32), r_att, atol=2e-2, rtol=2e-2)

    # bf16 operand path (v6e/v7x-friendly): bf16 weights/MXU, fp32 accumulation.
    fused16 = fuse_params(params, num_heads, compute_dtype=jnp.bfloat16)
    pooled_b, tokens_b, att_b = fwd(x, fused16)
    jax.block_until_ready((pooled_b, tokens_b, att_b))
    assert jnp.allclose(pooled_b.astype(jnp.float32), r_pooled, atol=5e-2, rtol=5e-2)
    assert jnp.allclose(tokens_b.astype(jnp.float32), r_tokens, atol=5e-2, rtol=5e-2)
    assert jnp.allclose(att_b.astype(jnp.float32), r_att, atol=5e-2, rtol=5e-2)

    print("KERNEL_OK")
</pallas_src>

<mosaic_0001>
module attributes {stable_mosaic.version = 11 : i64} {
  func.func @_attn_pool_kernel(%arg0: i32, %arg1: memref<2x32x16xf32, #tpu.memory_space<vmem>>, %arg2: memref<17x32xf32, #tpu.memory_space<vmem>>, %arg3: memref<32x96xf32, #tpu.memory_space<vmem>>, %arg4: memref<1x96xf32, #tpu.memory_space<vmem>>, %arg5: memref<32x128xf32, #tpu.memory_space<vmem>>, %arg6: memref<1x128xf32, #tpu.memory_space<vmem>>, %arg7: memref<2x17x128xf32, #tpu.memory_space<vmem>>, %arg8: memref<2x17x128xbf16, #tpu.memory_space<vmem>>) attributes {dimension_semantics = [#tpu.dimension_semantics<parallel>], iteration_bounds = array<i64: 1>, scalar_prefetch = 0 : i64, scratch_operands = 0 : i64, tpu.core_type = #tpu.core_type<tc>, window_params = [{transform_indices = @transform_0, window_bounds = array<i64: 2, 32, 16>}, {pipeline_mode = #tpu.pipeline_mode<synchronous>, transform_indices = @transform_1, window_bounds = array<i64: 17, 32>}, {pipeline_mode = #tpu.pipeline_mode<synchronous>, transform_indices = @transform_2, window_bounds = array<i64: 32, 96>}, {pipeline_mode = #tpu.pipeline_mode<synchronous>, transform_indices = @transform_3, window_bounds = array<i64: 1, 96>}, {pipeline_mode = #tpu.pipeline_mode<synchronous>, transform_indices = @transform_4, window_bounds = array<i64: 32, 128>}, {pipeline_mode = #tpu.pipeline_mode<synchronous>, transform_indices = @transform_5, window_bounds = array<i64: 1, 128>}, {transform_indices = @transform_6, window_bounds = array<i64: 2, 17, 128>}, {transform_indices = @transform_7, window_bounds = array<i64: 2, 17, 128>}]} {
    %c0 = arith.constant 0 : index
    %c0_0 = arith.constant 0 : index
    %c0_1 = arith.constant 0 : index
    %0 = vector.load %arg1[%c0, %c0_0, %c0_1] : memref<2x32x16xf32, #tpu.memory_space<vmem>>, vector<2x32x16xf32>
    %1 = tpu.transpose %0, [0, 2, 1] : vector<2x32x16xf32> -> vector<2x16x32xf32>
    %cst = arith.constant dense<0.000000e+00> : vector<2x32xf32>
    %2 = vector.multi_reduction <add>, %1, %cst [1] : vector<2x16x32xf32> to vector<2x32xf32>
    %3 = vector.shape_cast %2 : vector<2x32xf32> to vector<2x1x32xf32>
    %cst_2 = arith.constant 1.600000e+01 : f32
    %4 = vector.broadcast %cst_2 : f32 to vector<2x1x32xf32>
    %5 = arith.divf %3, %4 : vector<2x1x32xf32>
    %6 = tpu.concatenate %5, %1 in 1 : vector<2x1x32xf32>, vector<2x16x32xf32> -> vector<2x17x32xf32>
    %c0_3 = arith.constant 0 : index
    %c0_4 = arith.constant 0 : index
    %7 = vector.load %arg2[%c0_3, %c0_4] : memref<17x32xf32, #tpu.memory_space<vmem>>, vector<17x32xf32>
    %8 = vector.shape_cast %7 : vector<17x32xf32> to vector<1x17x32xf32>
    %9 = vector.broadcast %8 : vector<1x17x32xf32> to vector<2x17x32xf32>
    %10 = arith.addf %6, %9 : vector<2x17x32xf32>
    %11 = vector.shape_cast %10 : vector<2x17x32xf32> to vector<34x32xf32>
    %c0_5 = arith.constant 0 : index
    %c0_6 = arith.constant 0 : index
    %12 = vector.load %arg3[%c0_5, %c0_6] : memref<32x96xf32, #tpu.memory_space<vmem>>, vector<32x96xf32>
    %cst_7 = arith.constant dense<0.000000e+00> : vector<34x96xf32>
    %13 = tpu.matmul %11, %12, %cst_7 {dimension_numbers = #tpu.dot_dimension_numbers<[1], [0], [0], [1], [0, 0, 1, 1], [], []>} : vector<34x32xf32>, vector<32x96xf32>, vector<34x96xf32> -> vector<34x96xf32>
    %c0_8 = arith.constant 0 : index
    %c0_9 = arith.constant 0 : index
    %14 = vector.load %arg4[%c0_8, %c0_9] : memref<1x96xf32, #tpu.memory_space<vmem>>, vector<1x96xf32>
    %15 = vector.broadcast %14 : vector<1x96xf32> to vector<34x96xf32>
    %16 = arith.addf %13, %15 : vector<34x96xf32>
    %17 = vector.shape_cast %16 : vector<34x96xf32> to vector<2x17x96xf32>
    %cst_10 = arith.constant 0.000000e+00 : f32
    %18 = vector.broadcast %cst_10 : f32 to vector<2x17x17xf32>
    %cst_11 = arith.constant 0.000000e+00 : f32
    %19 = vector.broadcast %cst_11 : f32 to vector<34x128xf32>
    %20 = vector.extract_strided_slice %17 {offsets = [0, 0, 0], sizes = [2, 17, 8], strides = [1, 1, 1]} : vector<2x17x96xf32> to vector<2x17x8xf32>
    %21 = vector.extract_strided_slice %17 {offsets = [0, 0, 32], sizes = [2, 17, 8], strides = [1, 1, 1]} : vector<2x17x96xf32> to vector<2x17x8xf32>
    %22 = vector.extract_strided_slice %17 {offsets = [0, 0, 64], sizes = [2, 17, 8], strides = [1, 1, 1]} : vector<2x17x96xf32> to vector<2x17x8xf32>
    "tpu.trace_start"() <{level = 10 : i32, message = "bqd,bkd->bqk"}> : () -> ()
    %cst_12 = arith.constant dense<0.000000e+00> : vector<2x17x17xf32>
    %23 = tpu.matmul %20, %21, %cst_12 {dimension_numbers = #tpu.dot_dimension_numbers<[2], [2], [1], [1], [0, 0, 0, 1, 1, 1], [0], [0]>} : vector<2x17x8xf32>, vector<2x17x8xf32>, vector<2x17x17xf32> -> vector<2x17x17xf32>
    "tpu.trace_stop"() : () -> ()
    %cst_13 = arith.constant dense<0xFF800000> : vector<2x17xf32>
    %24 = vector.multi_reduction <maximumf>, %23, %cst_13 [2] : vector<2x17x17xf32> to vector<2x17xf32>
    %25 = vector.shape_cast %24 : vector<2x17xf32> to vector<2x17x1xf32>
    %26 = vector.broadcast %25 : vector<2x17x1xf32> to vector<2x17x17xf32>
    %27 = arith.subf %23, %26 : vector<2x17x17xf32>
    %28 = math.exp %27 : vector<2x17x17xf32>
    %cst_14 = arith.constant dense<0.000000e+00> : vector<2x17xf32>
    %29 = vector.multi_reduction <add>, %28, %cst_14 [2] : vector<2x17x17xf32> to vector<2x17xf32>
    %30 = vector.shape_cast %29 : vector<2x17xf32> to vector<2x17x1xf32>
    %31 = tpu.reciprocal %30 {approx = true} : vector<2x17x1xf32> -> vector<2x17x1xf32>
    %32 = vector.broadcast %31 : vector<2x17x1xf32> to vector<2x17x17xf32>
    %33 = arith.mulf %28, %32 : vector<2x17x17xf32>
    %34 = arith.addf %18, %33 : vector<2x17x17xf32>
    "tpu.trace_start"() <{level = 10 : i32, message = "bqk,bkd->bqd"}> : () -> ()
    %cst_15 = arith.constant dense<0.000000e+00> : vector<2x17x8xf32>
    %35 = tpu.matmul %33, %22, %cst_15 {dimension_numbers = #tpu.dot_dimension_numbers<[2], [1], [1], [2], [0, 0, 0, 1, 1, 2], [0], [0]>} : vector<2x17x17xf32>, vector<2x17x8xf32>, vector<2x17x8xf32> -> vector<2x17x8xf32>
    "tpu.trace_stop"() : () -> ()
    %36 = vector.shape_cast %35 : vector<2x17x8xf32> to vector<34x8xf32>
    %c0_16 = arith.constant 0 : index
    %c0_17 = arith.constant 0 : index
    %37 = vector.load %arg5[%c0_16, %c0_17] : memref<32x128xf32, #tpu.memory_space<vmem>>, vector<8x128xf32>
    %cst_18 = arith.constant dense<0.000000e+00> : vector<34x128xf32>
    %38 = tpu.matmul %36, %37, %cst_18 {dimension_numbers = #tpu.dot_dimension_numbers<[1], [0], [0], [1], [0, 0, 1, 1], [], []>} : vector<34x8xf32>, vector<8x128xf32>, vector<34x128xf32> -> vector<34x128xf32>
    %39 = arith.addf %19, %38 : vector<34x128xf32>
    %40 = vector.extract_strided_slice %17 {offsets = [0, 0, 8], sizes = [2, 17, 8], strides = [1, 1, 1]} : vector<2x17x96xf32> to vector<2x17x8xf32>
    %41 = vector.extract_strided_slice %17 {offsets = [0, 0, 40], sizes = [2, 17, 8], strides = [1, 1, 1]} : vector<2x17x96xf32> to vector<2x17x8xf32>
    %42 = vector.extract_strided_slice %17 {offsets = [0, 0, 72], sizes = [2, 17, 8], strides = [1, 1, 1]} : vector<2x17x96xf32> to vector<2x17x8xf32>
    "tpu.trace_start"() <{level = 10 : i32, message = "bqd,bkd->bqk"}> : () -> ()
    %cst_19 = arith.constant dense<0.000000e+00> : vector<2x17x17xf32>
    %43 = tpu.matmul %40, %41, %cst_19 {dimension_numbers = #tpu.dot_dimension_numbers<[2], [2], [1], [1], [0, 0, 0, 1, 1, 1], [0], [0]>} : vector<2x17x8xf32>, vector<2x17x8xf32>, vector<2x17x17xf32> -> vector<2x17x17xf32>
    "tpu.trace_stop"() : () -> ()
    %cst_20 = arith.constant dense<0xFF800000> : vector<2x17xf32>
    %44 = vector.multi_reduction <maximumf>, %43, %cst_20 [2] : vector<2x17x17xf32> to vector<2x17xf32>
    %45 = vector.shape_cast %44 : vector<2x17xf32> to vector<2x17x1xf32>
    %46 = vector.broadcast %45 : vector<2x17x1xf32> to vector<2x17x17xf32>
    %47 = arith.subf %43, %46 : vector<2x17x17xf32>
    %48 = math.exp %47 : vector<2x17x17xf32>
    %cst_21 = arith.constant dense<0.000000e+00> : vector<2x17xf32>
    %49 = vector.multi_reduction <add>, %48, %cst_21 [2] : vector<2x17x17xf32> to vector<2x17xf32>
    %50 = vector.shape_cast %49 : vector<2x17xf32> to vector<2x17x1xf32>
    %51 = tpu.reciprocal %50 {approx = true} : vector<2x17x1xf32> -> vector<2x17x1xf32>
    %52 = vector.broadcast %51 : vector<2x17x1xf32> to vector<2x17x17xf32>
    %53 = arith.mulf %48, %52 : vector<2x17x17xf32>
    %54 = arith.addf %34, %53 : vector<2x17x17xf32>
    "tpu.trace_start"() <{level = 10 : i32, message = "bqk,bkd->bqd"}> : () -> ()
    %cst_22 = arith.constant dense<0.000000e+00> : vector<2x17x8xf32>
    %55 = tpu.matmul %53, %42, %cst_22 {dimension_numbers = #tpu.dot_dimension_numbers<[2], [1], [1], [2], [0, 0, 0, 1, 1, 2], [0], [0]>} : vector<2x17x17xf32>, vector<2x17x8xf32>, vector<2x17x8xf32> -> vector<2x17x8xf32>
    "tpu.trace_stop"() : () -> ()
    %56 = vector.shape_cast %55 : vector<2x17x8xf32> to vector<34x8xf32>
    %c8 = arith.constant 8 : index
    %c0_23 = arith.constant 0 : index
    %57 = vector.load %arg5[%c8, %c0_23] : memref<32x128xf32, #tpu.memory_space<vmem>>, vector<8x128xf32>
    %cst_24 = arith.constant dense<0.000000e+00> : vector<34x128xf32>
    %58 = tpu.matmul %56, %57, %cst_24 {dimension_numbers = #tpu.dot_dimension_numbers<[1], [0], [0], [1], [0, 0, 1, 1], [], []>} : vector<34x8xf32>, vector<8x128xf32>, vector<34x128xf32> -> vector<34x128xf32>
    %59 = arith.addf %39, %58 : vector<34x128xf32>
    %60 = vector.extract_strided_slice %17 {offsets = [0, 0, 16], sizes = [2, 17, 8], strides = [1, 1, 1]} : vector<2x17x96xf32> to vector<2x17x8xf32>
    %61 = vector.extract_strided_slice %17 {offsets = [0, 0, 48], sizes = [2, 17, 8], strides = [1, 1, 1]} : vector<2x17x96xf32> to vector<2x17x8xf32>
    %62 = vector.extract_strided_slice %17 {offsets = [0, 0, 80], sizes = [2, 17, 8], strides = [1, 1, 1]} : vector<2x17x96xf32> to vector<2x17x8xf32>
    "tpu.trace_start"() <{level = 10 : i32, message = "bqd,bkd->bqk"}> : () -> ()
    %cst_25 = arith.constant dense<0.000000e+00> : vector<2x17x17xf32>
    %63 = tpu.matmul %60, %61, %cst_25 {dimension_numbers = #tpu.dot_dimension_numbers<[2], [2], [1], [1], [0, 0, 0, 1, 1, 1], [0], [0]>} : vector<2x17x8xf32>, vector<2x17x8xf32>, vector<2x17x17xf32> -> vector<2x17x17xf32>
    "tpu.trace_stop"() : () -> ()
    %cst_26 = arith.constant dense<0xFF800000> : vector<2x17xf32>
    %64 = vector.multi_reduction <maximumf>, %63, %cst_26 [2] : vector<2x17x17xf32> to vector<2x17xf32>
    %65 = vector.shape_cast %64 : vector<2x17xf32> to vector<2x17x1xf32>
    %66 = vector.broadcast %65 : vector<2x17x1xf32> to vector<2x17x17xf32>
    %67 = arith.subf %63, %66 : vector<2x17x17xf32>
    %68 = math.exp %67 : vector<2x17x17xf32>
    %cst_27 = arith.constant dense<0.000000e+00> : vector<2x17xf32>
    %69 = vector.multi_reduction <add>, %68, %cst_27 [2] : vector<2x17x17xf32> to vector<2x17xf32>
    %70 = vector.shape_cast %69 : vector<2x17xf32> to vector<2x17x1xf32>
    %71 = tpu.reciprocal %70 {approx = true} : vector<2x17x1xf32> -> vector<2x17x1xf32>
    %72 = vector.broadcast %71 : vector<2x17x1xf32> to vector<2x17x17xf32>
    %73 = arith.mulf %68, %72 : vector<2x17x17xf32>
    %74 = arith.addf %54, %73 : vector<2x17x17xf32>
    "tpu.trace_start"() <{level = 10 : i32, message = "bqk,bkd->bqd"}> : () -> ()
    %cst_28 = arith.constant dense<0.000000e+00> : vector<2x17x8xf32>
    %75 = tpu.matmul %73, %62, %cst_28 {dimension_numbers = #tpu.dot_dimension_numbers<[2], [1], [1], [2], [0, 0, 0, 1, 1, 2], [0], [0]>} : vector<2x17x17xf32>, vector<2x17x8xf32>, vector<2x17x8xf32> -> vector<2x17x8xf32>
    "tpu.trace_stop"() : () -> ()
    %76 = vector.shape_cast %75 : vector<2x17x8xf32> to vector<34x8xf32>
    %c16 = arith.constant 16 : index
    %c0_29 = arith.constant 0 : index
    %77 = vector.load %arg5[%c16, %c0_29] : memref<32x128xf32, #tpu.memory_space<vmem>>, vector<8x128xf32>
    %cst_30 = arith.constant dense<0.000000e+00> : vector<34x128xf32>
    %78 = tpu.matmul %76, %77, %cst_30 {dimension_numbers = #tpu.dot_dimension_numbers<[1], [0], [0], [1], [0, 0, 1, 1], [], []>} : vector<34x8xf32>, vector<8x128xf32>, vector<34x128xf32> -> vector<34x128xf32>
    %79 = arith.addf %59, %78 : vector<34x128xf32>
    %80 = vector.extract_strided_slice %17 {offsets = [0, 0, 24], sizes = [2, 17, 8], strides = [1, 1, 1]} : vector<2x17x96xf32> to vector<2x17x8xf32>
    %81 = vector.extract_strided_slice %17 {offsets = [0, 0, 56], sizes = [2, 17, 8], strides = [1, 1, 1]} : vector<2x17x96xf32> to vector<2x17x8xf32>
    %82 = vector.extract_strided_slice %17 {offsets = [0, 0, 88], sizes = [2, 17, 8], strides = [1, 1, 1]} : vector<2x17x96xf32> to vector<2x17x8xf32>
    "tpu.trace_start"() <{level = 10 : i32, message = "bqd,bkd->bqk"}> : () -> ()
    %cst_31 = arith.constant dense<0.000000e+00> : vector<2x17x17xf32>
    %83 = tpu.matmul %80, %81, %cst_31 {dimension_numbers = #tpu.dot_dimension_numbers<[2], [2], [1], [1], [0, 0, 0, 1, 1, 1], [0], [0]>} : vector<2x17x8xf32>, vector<2x17x8xf32>, vector<2x17x17xf32> -> vector<2x17x17xf32>
    "tpu.trace_stop"() : () -> ()
    %cst_32 = arith.constant dense<0xFF800000> : vector<2x17xf32>
    %84 = vector.multi_reduction <maximumf>, %83, %cst_32 [2] : vector<2x17x17xf32> to vector<2x17xf32>
    %85 = vector.shape_cast %84 : vector<2x17xf32> to vector<2x17x1xf32>
    %86 = vector.broadcast %85 : vector<2x17x1xf32> to vector<2x17x17xf32>
    %87 = arith.subf %83, %86 : vector<2x17x17xf32>
    %88 = math.exp %87 : vector<2x17x17xf32>
    %cst_33 = arith.constant dense<0.000000e+00> : vector<2x17xf32>
    %89 = vector.multi_reduction <add>, %88, %cst_33 [2] : vector<2x17x17xf32> to vector<2x17xf32>
    %90 = vector.shape_cast %89 : vector<2x17xf32> to vector<2x17x1xf32>
    %91 = tpu.reciprocal %90 {approx = true} : vector<2x17x1xf32> -> vector<2x17x1xf32>
    %92 = vector.broadcast %91 : vector<2x17x1xf32> to vector<2x17x17xf32>
    %93 = arith.mulf %88, %92 : vector<2x17x17xf32>
    %94 = arith.addf %74, %93 : vector<2x17x17xf32>
    "tpu.trace_start"() <{level = 10 : i32, message = "bqk,bkd->bqd"}> : () -> ()
    %cst_34 = arith.constant dense<0.000000e+00> : vector<2x17x8xf32>
    %95 = tpu.matmul %93, %82, %cst_34 {dimension_numbers = #tpu.dot_dimension_numbers<[2], [1], [1], [2], [0, 0, 0, 1, 1, 2], [0], [0]>} : vector<2x17x17xf32>, vector<2x17x8xf32>, vector<2x17x8xf32> -> vector<2x17x8xf32>
    "tpu.trace_stop"() : () -> ()
    %96 = vector.shape_cast %95 : vector<2x17x8xf32> to vector<34x8xf32>
    %c24 = arith.constant 24 : index
    %c0_35 = arith.constant 0 : index
    %97 = vector.load %arg5[%c24, %c0_35] : memref<32x128xf32, #tpu.memory_space<vmem>>, vector<8x128xf32>
    %cst_36 = arith.constant dense<0.000000e+00> : vector<34x128xf32>
    %98 = tpu.matmul %96, %97, %cst_36 {dimension_numbers = #tpu.dot_dimension_numbers<[1], [0], [0], [1], [0, 0, 1, 1], [], []>} : vector<34x8xf32>, vector<8x128xf32>, vector<34x128xf32> -> vector<34x128xf32>
    %99 = arith.addf %79, %98 : vector<34x128xf32>
    %c0_37 = arith.constant 0 : index
    %c0_38 = arith.constant 0 : index
    %100 = vector.load %arg6[%c0_37, %c0_38] : memref<1x128xf32, #tpu.memory_space<vmem>>, vector<1x128xf32>
    %101 = vector.broadcast %100 : vector<1x128xf32> to vector<34x128xf32>
    %102 = arith.addf %99, %101 : vector<34x128xf32>
    %103 = vector.shape_cast %102 : vector<34x128xf32> to vector<2x17x128xf32>
    %c0_39 = arith.constant 0 : index
    %c0_40 = arith.constant 0 : index
    %c0_41 = arith.constant 0 : index
    %104 = vector.load %arg7[%c0_39, %c0_40, %c0_41] : memref<2x17x128xf32, #tpu.memory_space<vmem>>, vector<2x17x128xf32>
    tpu.vector_store %arg7[%c0_39, %c0_40, %c0_41], %103 {strides = array<i32>} : memref<2x17x128xf32, #tpu.memory_space<vmem>>, vector<2x17x128xf32>,
    %cst_42 = arith.constant 2.500000e-01 : f32
    %105 = vector.broadcast %cst_42 : f32 to vector<2x17x17xf32>
    %106 = arith.mulf %94, %105 : vector<2x17x17xf32>
    %107 = arith.truncf %106 : vector<2x17x17xf32> to vector<2x17x17xbf16>
    %cst_43 = arith.constant 0.000000e+00 : bf16
    %108 = vector.broadcast %cst_43 : bf16 to vector<2x17x111xbf16>
    %109 = tpu.concatenate %107, %108 in 2 : vector<2x17x17xbf16>, vector<2x17x111xbf16> -> vector<2x17x128xbf16>
    %c0_44 = arith.constant 0 : index
    %c0_45 = arith.constant 0 : index
    %c0_46 = arith.constant 0 : index
    %110 = vector.load %arg8[%c0_44, %c0_45, %c0_46] : memref<2x17x128xbf16, #tpu.memory_space<vmem>>, vector<2x17x128xbf16>
    tpu.vector_store %arg8[%c0_44, %c0_45, %c0_46], %109 {strides = array<i32>} : memref<2x17x128xbf16, #tpu.memory_space<vmem>>, vector<2x17x128xbf16>,
    return
  }
  func.func @transform_0(%arg0: i32) -> (i32, i32, i32) {
    %c0_i32 = arith.constant 0 : i32
    %c0_i32_0 = arith.constant 0 : i32
    %c0_i32_1 = arith.constant 0 : i32
    return %arg0, %c0_i32, %c0_i32_0 : i32, i32, i32
  }
  func.func @transform_1(%arg0: i32) -> (i32, i32) {
    %c0_i32 = arith.constant 0 : i32
    %c0_i32_0 = arith.constant 0 : i32
    %c0_i32_1 = arith.constant 0 : i32
    return %c0_i32, %c0_i32_0 : i32, i32
  }
  func.func @transform_2(%arg0: i32) -> (i32, i32) {
    %c0_i32 = arith.constant 0 : i32
    %c0_i32_0 = arith.constant 0 : i32
    %c0_i32_1 = arith.constant 0 : i32
    return %c0_i32, %c0_i32_0 : i32, i32
  }
  func.func @transform_3(%arg0: i32) -> (i32, i32) {
    %c0_i32 = arith.constant 0 : i32
    %c0_i32_0 = arith.constant 0 : i32
    %c0_i32_1 = arith.constant 0 : i32
    return %c0_i32, %c0_i32_0 : i32, i32
  }
  func.func @transform_4(%arg0: i32) -> (i32, i32) {
    %c0_i32 = arith.constant 0 : i32
    %c0_i32_0 = arith.constant 0 : i32
    %c0_i32_1 = arith.constant 0 : i32
    return %c0_i32, %c0_i32_0 : i32, i32
  }
  func.func @transform_5(%arg0: i32) -> (i32, i32) {
    %c0_i32 = arith.constant 0 : i32
    %c0_i32_0 = arith.constant 0 : i32
    %c0_i32_1 = arith.constant 0 : i32
    return %c0_i32, %c0_i32_0 : i32, i32
  }
  func.func @transform_6(%arg0: i32) -> (i32, i32, i32) {
    %c0_i32 = arith.constant 0 : i32
    %c0_i32_0 = arith.constant 0 : i32
    %c0_i32_1 = arith.constant 0 : i32
    return %arg0, %c0_i32, %c0_i32_0 : i32, i32, i32
  }
  func.func @transform_7(%arg0: i32) -> (i32, i32, i32) {
    %c0_i32 = arith.constant 0 : i32
    %c0_i32_0 = arith.constant 0 : i32
    %c0_i32_1 = arith.constant 0 : i32
    return %arg0, %c0_i32, %c0_i32_0 : i32, i32, i32
  }
}

</mosaic_0001>

<bundles_post_ra>
// kernel: attention_pool2d.1
= control target key start
LH: loop header
LB: loop body
LE: loop exit
PB: predicated region body
PF: predicated region fallthrough
CT: control target
= control target key end

     0   :  { %v6621_v8 = vmov 0.0|0.0   ;;  %vm6622_vm0 = vmmov 0   ;;  %v6623_v12 = vmov 0.0   ;;  %vm98_vm1 = vcmask 261120   ;;  %s6626_s30 = smov 64   ;;  %s6627_s8 = smov 88   ;;  %s7882_s0 = inlined_call_operand.vmem [shape: f32[2,32,16], index: 0, kind: input, shape index: {}]   ;;  %s7883_s2 = inlined_call_operand.vmem [shape: f32[32,96], index: 2, kind: input, shape index: {}]   ;;  %s7884_s1 = inlined_call_operand.vmem [shape: f32[17,32], index: 1, kind: input, shape index: {}]   ;;  %s7885_s3 = inlined_call_operand.vmem [shape: f32[1,96], index: 3, kind: input, shape index: {}]   ;;  %s7886_s4 = inlined_call_operand.vmem [shape: f32[32,128], index: 4, kind: input, shape index: {}]   ;;  %s7887_s7 = inlined_call_operand.vmem [shape: bf16[2,17,128], index: 7, kind: output, shape index: {1}]   ;;  %s7888_s5 = inlined_call_operand.vmem [shape: f32[1,128], index: 5, kind: input, shape index: {}]   ;;  %s7889_s6 = inlined_call_operand.vmem [shape: f32[2,17,128], index: 6, kind: output, shape index: {0}]  }
   0x1   :  { %v30_v0 = vld [vmem:[%s7882_s0 + $0x20] sm:$0xff]  ;;  %v31_v2 = vld [vmem:[%s7882_s0 + $0x28] sm:$0xff]  ;;  %v32_v4 = vld [vmem:[%s7882_s0 + $0x30] sm:$0xff]  ;;  %6364 = vmatprep.subr.bf16.mxu0 %v6621_v8  ;;  %6041 = vmatprep.mubr.msk.f32.mxu0 %vm6622_vm0, %v6623_v12  ;;  %v158_v20 = vlaneseq  ;;  %vm124_vm2 = vcmask 1040384   ;;  %v6624_v23 = vmov 1966171168  }
   0x2   :  { %v26_v1 = vld [vmem:[%s7882_s0] sm:$0xff]  ;;  %66 = vxpose.xlu1.b32.start [1/4] (short) (narrow) %v30_v0, 16  ;;  %v27_v3 = vld [vmem:[%s7882_s0 + $0x8] sm:$0xff]  ;;  %v28_v5 = vld [vmem:[%s7882_s0 + $0x10] sm:$0xff]  ;;  %6370 = vmatprep.subr.bf16.mxu1 %v6621_v8  ;;  %v156_v24 = vunpack.c.l.s4 %v6624_v23  ;;  %vm1041_vm3 = vcmask 64512   ;;  %vm1344_vm5 = vcmask 138240  }
   0x3   :  { %34 = vxpose.xlu0.b32.start [1/4] (short) (narrow) %v26_v1, 16  ;;  %v33_v6 = vld [vmem:[%s7882_s0 + $0x38] sm:$0xff]  ;;  %v378_v9 = vld [vmem:[%s7883_s2] sm:$0xff]  ;;  %v379_v10 = vld [vmem:[%s7883_s2 + $0x8] sm:$0xff]  ;;  %6062 = vmatprep.mubr.msk.f32.mxu1 %vm6622_vm0, %v6623_v12  ;;  %v159_v34 = vshrl.u32 %v158_v20, 7  ;;  %vm1351_vm6 = vcmask 131072  }
   0x4   :  { %v29_v7 = vld [vmem:[%s7882_s0 + $0x18] sm:$0xff]  ;;  %v380_v11 = vld [vmem:[%s7883_s2 + $0x10] sm:$0xff]  ;;  %v6365_v13 = vpack.c.bf16 %v379_v10, %v378_v9  ;;  %v140_v27 = vld [vmem:[%s7884_s1 + $0x8] sm:$0xff]  ;;  %v157_v37 = vunpack.c.0.s8 %v156_v24  ;;  %s6628_s9 = smov 120   ;;  %s6629_s10 = smov 56  }
   0x5   :  { %v381_v14 = vld [vmem:[%s7883_s2 + $0x18] sm:$0xff]  ;;  %v141_v53 = vld [vmem:[%s7884_s1 + $0x10] sm:$0x1]  ;;  %v139_v63 = vld [vmem:[%s7884_s1] sm:$0xff]  ;;  %s6630_s11 = smov 112   ;;  %s6631_s12 = smov 80  }
   0x6   :  { %67 = vxpose.xlu1.b32.cont [2/4] (short) (narrow) %v31_v2, 16  ;;  %6366 = vmatpush3.bf16.msra.mxu0 %v6365_v13  ;;  %v6368_v15 = vpack.c.bf16 %v381_v14, %v380_v11  ;;  %v6733_v45 = vsub.s32 %v157_v37, %v159_v34  ;;  %vm6926_vm4 = vmpackc.low %vm1041_vm3, %vm1041_vm3  ;;  %s6632_s17 = smov 48   ;;  %s6633_s18 = smov 72   ;;  %vm5743_vm7 = vsmask.f32 256 }
   0x7   :  { %35 = vxpose.xlu0.b32.cont [2/4] (short) (narrow) %v27_v3, 16  ;;  %6367 = vmatprep.subr.bf16.mxu0 %v6621_v8  ;;  %s6634_s19 = smov 104   ;;  %s6635_s22 = smov 40   ;;  %vm7691_vm8 = vmand %vm124_vm2, %vm5743_vm7 }
   0xa   :  { %68 = vxpose.xlu1.b32.cont [3/4] (short) (narrow) %v32_v4, 16  ;;  %6369 = vmatpush3.bf16.msra.mxu0 %v6368_v15 }
   0xb   :  { %36 = vxpose.xlu0.b32.cont [3/4] (short) (narrow) %v28_v5, 16  ;;  %6378 = vmatprep.subr.bf16.mxu0 %v6621_v8 }
   0xe   :  { %69 = vxpose.xlu1.b32.end [4/4] (short) (narrow) %v33_v6, 16 }
   0xf   :  { %37 = vxpose.xlu0.b32.end [4/4] (short) (narrow) %v29_v7, 16 }
  0x82   :  { %v82_v16 = vpop.trf.xlu1 }
  0x83   :  { %v6720_v17 = vpop.trf.xlu0  ;;  %v108_v18 = vsel %vm98_vm1, %v82_v16, 0.0  ;;  %v128_v19 = vrot.slane %v82_v16, 7 }
  0x84   :  { %v99_v21 = vsel %vm98_vm1, %v6720_v17, 0.0  ;;  %v125_v22 = vrot.slane %v6720_v17, 7 }
  0x86   :  { %v83_v25 = vpop.trf.xlu1 }
  0x87   :  { %v51_v26 = vpop.trf.xlu0  ;;  %v109_v28 = vsel %vm98_vm1, %v83_v25, 0.0  ;;  %v129_v29 = vrot.slane %v83_v25, 7 }
  0x88   :  { %v100_v30 = vsel %vm98_vm1, %v51_v26, 0.0  ;;  %v126_v31 = vrot.slane %v51_v26, 7  ;;  %v110_v32 = vadd.f32 %v109_v28, %v108_v18 }
  0x89   :  { %v101_v33 = vadd.f32 %v100_v30, %v99_v21  ;;  %v130_v35 = vsel %vm124_vm2, %v128_v19, %v129_v29  ;;  %v6749_v6 = vadd.f32 %v141_v53, %v129_v29 }
  0x8a   :  { %v127_v36 = vsel %vm124_vm2, %v125_v22, %v126_v31  ;;  %v111_v38 = vrot.slane %v110_v32, 4  ;;  %v146_v41 = vadd.f32 %v140_v27, %v130_v35  ;;  %v144_v62 = vadd.f32 %v141_v53, %v126_v31 }
  0x8b   :  { %v102_v39 = vrot.slane %v101_v33, 4  ;;  %v143_v40 = vadd.f32 %v140_v27, %v127_v36 }
  0x8c   :  { %v112_v42 = vadd.f32 %v111_v38, %v110_v32  ;;  %v315_v47 = vcombine.high %v146_v41, %v146_v41  ;;  %v322_v51 = vrot.slane %v146_v41, %v6733_v45  ;;  %v258_v14 = vrot.slane %v144_v62, %v6733_v45 }
  0x8d   :  { %v103_v43 = vadd.f32 %v102_v39, %v101_v33  ;;  %v203_v44 = vcombine.high %v143_v40, %v143_v40  ;;  %v210_v55 = vrot.slane %v143_v40, %v6733_v45 }
  0x8e   :  { %v113_v46 = vrot.slane %v112_v42, 2  ;;  %v329_v56 = vrot.slane %v315_v47, %v6733_v45  ;;  %v330_v60 = vcombine.high %v322_v51, %v322_v51  ;;  %v6746_v3 = vrot.slane %v322_v51, %v6733_v45 }
  0x8f   :  { %v104_v48 = vrot.slane %v103_v43, 2  ;;  %v217_v50 = vrot.slane %v203_v44, %v6733_v45  ;;  %v218_v1 = vcombine.high %v210_v55, %v210_v55  ;;  %v226_v16 = vrot.slane %v210_v55, %v6733_v45 }
  0x90   :  { %v114_v49 = vadd.f32 %v113_v46, %v112_v42  ;;  %v331_v2 = vcombine.high %v329_v56, %v329_v56  ;;  %v345_v7 = vrot.slane %v329_v56, %v6733_v45  ;;  %v352_v11 = vrot.slane %v330_v60, %v6733_v45 }
  0x91   :  { %v105_v52 = vadd.f32 %v104_v48, %v103_v43  ;;  %v219_v59 = vcombine.high %v217_v50, %v217_v50  ;;  %v233_v17 = vrot.slane %v217_v50, %v6733_v45  ;;  %v240_v18 = vrot.slane %v218_v1, %v6733_v45 }
  0x92   :  { %v115_v54 = vrot.slane %v114_v49, 1  ;;  %v6761_v21 = vrot.slane %v331_v2, %v6733_v45  ;;  %v360_v23 = vcombine.high %v6746_v3, %v6746_v3  ;;  %v361_v24 = vcombine.high %v345_v7, %v345_v7 }
  0x93   :  { %v106_v57 = vrot.slane %v105_v52, 1  ;;  %v247_v9 = vrot.slane %v219_v59, %v6733_v45  ;;  %v362_v29 = vcombine.high %v352_v11, %v352_v11  ;;  %v438_v31 = vcombine.low %v226_v16, %v240_v18 }
  0x94   :  { %v116_v58 = vadd.f32 %v115_v54, %v114_v49  ;;  %v5764_v32 = vcombine.high %v226_v16, %v240_v18  ;;  %v537_v60 = vcombine.low %v352_v11, %v360_v23 }
  0x95   :  { %v107_v61 = vadd.f32 %v106_v57, %v105_v52  ;;  %v440_v26 = vcombine.low %v233_v17, %v247_v9  ;;  %v5765_v38 = vcombine.high %v233_v17, %v247_v9  ;;  %v448_v62 = vrot.slane %v438_v31, %v6733_v45 }
  0x96   :  { %v119_v0 = vmul.f32 0.0625, %v116_v58  ;;  %v370_v17 = vrot.slane %v6749_v6, %v6733_v45 }
  0x97   :  { %v118_v4 = vmul.f32 0.0625, %v107_v61  ;;  %v462_v42 = vrot.slane %v440_v26, %v6733_v45  ;;  %v469_v53 = vrot.slane %v5765_v38, %v6733_v45  ;;  %v265_v61 = vrot.slane %v258_v14, %v6733_v45 }
  0x98   :  { %v138_v5 = vsel %vm124_vm2, %v119_v0, %v128_v19  ;;  %v377_v31 = vrot.slane %v370_v17, %v6733_v45 }
  0x99   :  { %v145_v10 = vadd.f32 %v139_v63, %v138_v5  ;;  %v137_v13 = vsel %vm124_vm2, %v118_v4, %v125_v22  ;;  %v538_v5 = vcombine.low %v362_v29, %v345_v7 }
  0x9a   :  { %v142_v15 = vadd.f32 %v139_v63, %v137_v13  ;;  %v455_v63 = vrot.slane %v5764_v32, %v6733_v45  ;;  %v539_v13 = vcombine.low %v6761_v21, %v361_v24  ;;  %v553_v24 = vrot.slane %v537_v60, %v6733_v45 }
  0x9b   :  { %v266_v19 = vcombine.high %v145_v10, %v145_v10  ;;  %v273_v20 = vrot.slane %v145_v10, %v6733_v45  ;;  %v471_v10 = vcombine.low %v462_v42, %v469_v53 }
  0x9c   :  { %v154_v22 = vcombine.high %v142_v15, %v142_v15  ;;  %v161_v25 = vrot.slane %v142_v15, %v6733_v45 }
  0x9d   :  { %v280_v27 = vrot.slane %v266_v19, %v6733_v45  ;;  %v281_v28 = vcombine.high %v273_v20, %v273_v20  ;;  %v289_v30 = vrot.slane %v273_v20, %v6733_v45  ;;  %v470_v20 = vcombine.low %v448_v62, %v455_v63 }
  0x9e   :  { %v168_v33 = vrot.slane %v154_v22, %v6733_v45  ;;  %v169_v34 = vcombine.high %v161_v25, %v161_v25  ;;  %v177_v40 = vrot.slane %v161_v25, %v6733_v45  ;;  %v485_v23 = vrot.slane %v471_v10, %v6733_v45 }
  0x9f   :  { %v282_v35 = vcombine.high %v280_v27, %v280_v27  ;;  %v296_v36 = vrot.slane %v280_v27, %v6733_v45  ;;  %v303_v37 = vrot.slane %v281_v28, %v6733_v45  ;;  %v311_v44 = vcombine.high %v289_v30, %v289_v30 }
  0xa0   :  { %v170_v39 = vcombine.high %v168_v33, %v168_v33  ;;  %v191_v41 = vrot.slane %v169_v34, %v6733_v45  ;;  %v184_v48 = vrot.slane %v168_v33, %v6733_v45  ;;  %v487_v9 = vcombine.low %v265_v61, %v289_v30 }
  0xa1   :  { %v310_v43 = vrot.slane %v282_v35, %v6733_v45  ;;  %v312_v46 = vcombine.high %v296_v36, %v296_v36  ;;  %v313_v47 = vcombine.high %v303_v37, %v303_v37  ;;  %v488_v4 = vcombine.low %v303_v37, %v311_v44 }
  0xa2   :  { %v198_v49 = vrot.slane %v170_v39, %v6733_v45  ;;  %v389_v50 = vcombine.low %v177_v40, %v191_v41  ;;  %v5762_v51 = vcombine.high %v177_v40, %v191_v41  ;;  %v567_v22 = vrot.slane %v539_v13, %v6733_v45 }
  0xa3   :  { %v314_v52 = vcombine.high %v310_v43, %v310_v43  ;;  %v489_v54 = vcombine.low %v313_v47, %v296_v36  ;;  %v490_v55 = vcombine.low %v310_v43, %v312_v46  ;;  %v504_v7 = vrot.slane %v488_v4, %v6733_v45  ;;  %v6828_v43 = vld [vmem:[%s7885_s3] ss:$0 sm:$0xff]  ;;  %s6625_s3 = smov 96  }
  0xa4   :  { %v391_v56 = vcombine.low %v184_v48, %v198_v49  ;;  %v5763_v57 = vcombine.high %v184_v48, %v198_v49  ;;  %v399_v58 = vrot.slane %v389_v50, %v6733_v45  ;;  %v406_v59 = vrot.slane %v5762_v51, %v6733_v45 }
  0xa5   :  { %v536_v15 = vcombine.low %v314_v52, %v6746_v3  ;;  %v511_v14 = vrot.slane %v489_v54, %v6733_v45  ;;  %v518_v16 = vrot.slane %v490_v55, %v6733_v45  ;;  %v560_v3 = vrot.slane %v538_v5, %v6733_v45 }
  0xa6   :  { %v413_v0 = vrot.slane %v391_v56, %v6733_v45  ;;  %v420_v1 = vrot.slane %v5763_v57, %v6733_v45  ;;  %v421_v2 = vcombine.low %v399_v58, %v406_v59  ;;  %v497_v26 = vrot.slane %v487_v9, %v6733_v45 }
  0xa7   :  { %v520_v27 = vcombine.low %v511_v14, %v518_v16  ;;  %v546_v6 = vrot.slane %v536_v15, %v6733_v45  ;;  %v478_v28 = vrot.slane %v470_v20, %v6733_v45  ;;  %v363_v30 = vcombine.high %v6761_v21, %v6761_v21 }
  0xa8   :  { %v422_v11 = vcombine.low %v413_v0, %v420_v1  ;;  %v429_v18 = vrot.slane %v421_v2, %v6733_v45  ;;  %v519_v29 = vcombine.low %v497_v26, %v504_v7  ;;  %v569_v35 = vcombine.low %v560_v3, %v567_v22 }
  0xa9   :  { %v486_v32 = vcombine.low %v478_v28, %v485_v23  ;;  %v534_v33 = vrot.slane %v520_v27, %v6733_v45  ;;  %v568_v34 = vcombine.low %v546_v6, %v553_v24  ;;  %v585_v37 = vcombine.low %v363_v30, %v377_v31 }
  0xaa   :  { %v436_v19 = vrot.slane %v422_v11, %v6733_v45  ;;  %v527_v36 = vrot.slane %v519_v29, %v6733_v45  ;;  %v583_v39 = vrot.slane %v569_v35, %v6733_v45 }
  0xab   :  { %v576_v21 = vrot.slane %v568_v34, %v6733_v45  ;;  %v592_v41 = vrot.slane %v585_v37, %v6733_v45 }
  0xac   :  { %v437_v25 = vcombine.low %v429_v18, %v436_v19  ;;  %v535_v38 = vcombine.low %v527_v36, %v534_v33 }
  0xad   :  { %v584_v40 = vcombine.low %v576_v21, %v583_v39  ;;  %v599_v42 = vrot.slane %v592_v41, %v6733_v45 }
  0xae   :  { %6042 = vmatmul.mubr.msk.f32.vlgmr.msra.gmra.mrb[0].mxu0 %vm98_vm1, %v437_v25 }
  0xaf   :  { %6044 = vmatprep.mubr.msk.f32.mxu0 %vm6622_vm0, %v6623_v12 }
  0xb2   :  { %6045 = vmatmul.mubr.msk.f32.gmra.mrb[2].mxu0 %vm98_vm1, %v486_v32 }
  0xb3   :  { %6047 = vmatprep.mubr.msk.f32.mxu0 %vm6622_vm0, %v6623_v12 }
  0xb6   :  { %6048 = vmatmul.mubr.msk.f32.gmra.mrb[4].mxu0 %vm98_vm1, %v535_v38 }
  0xb7   :  { %6050 = vmatprep.mubr.msk.f32.mxu0 %vm6622_vm0, %v6623_v12 }
  0xba   :  { %6051 = vmatmul.mubr.msk.f32.gmra.mrb[6].mxu0 %vm98_vm1, %v584_v40 }
  0xbb   :  { %6053 = vmatprep.mubr.msk.f32.mxu0 %vm6622_vm0, %v6623_v12 }
  0xbe   :  { %6054 = vmatmul.mubr.msk.f32.gmra.mrb[8].mxu0 %vm98_vm1, %v599_v42 }
  0xbf   :  { %6092 = vmatprep.mubr.msk.f32.mxu0 %vm6622_vm0, %v6623_v12 }
 0x181   :  { %v676_v44 = vpop.f32.mrb[0].mxu0 }
 0x182   :  { %v677_v46 = vadd.f32 %v6828_v43, %v676_v44  ;;  %v6043_v47 = vpop.f32.mrb[1].mxu0 }
 0x184   :  { %v705_v48 = vcombine.high %v677_v46, %v677_v46  ;;  %v712_v49 = vrot.slane %v677_v46, %v6733_v45 }
 0x185   :  { %v681_v50 = vpop.f32.mrb[2].mxu0 }
 0x186   :  { %v719_v51 = vrot.slane %v705_v48, %v6733_v45  ;;  %v720_v52 = vcombine.high %v712_v49, %v712_v49  ;;  %v682_v53 = vadd.f32 %v6828_v43, %v681_v50  ;;  %v6046_v54 = vpop.f32.mrb[3].mxu0  ;;  %v728_v56 = vrot.slane %v712_v49, %v6733_v45 }
 0x188   :  { %v721_v55 = vcombine.high %v719_v51, %v719_v51  ;;  %v742_v57 = vrot.slane %v720_v52, %v6733_v45  ;;  %v754_v58 = vcombine.high %v682_v53, %v682_v53  ;;  %v735_v59 = vrot.slane %v719_v51, %v6733_v45 }
 0x189   :  { %v761_v60 = vrot.slane %v682_v53, %v6733_v45  ;;  %v686_v61 = vpop.f32.mrb[4].mxu0 }
 0x18a   :  { %v749_v62 = vrot.slane %v721_v55, %v6733_v45  ;;  %v923_v63 = vcombine.low %v728_v56, %v742_v57  ;;  %v5771_v0 = vcombine.high %v728_v56, %v742_v57  ;;  %v768_v1 = vrot.slane %v754_v58, %v6733_v45  ;;  %v6049_v2 = vpop.f32.mrb[5].mxu0 }
 0x18b   :  { %v769_v4 = vcombine.high %v761_v60, %v761_v60  ;;  %v687_v5 = vadd.f32 %v6828_v43, %v686_v61  ;;  %v777_v15 = vrot.slane %v761_v60, %v6733_v45 }
 0x18c   :  { %v925_v9 = vcombine.low %v735_v59, %v749_v62  ;;  %v5772_v10 = vcombine.high %v735_v59, %v749_v62  ;;  %v933_v13 = vrot.slane %v923_v63, %v6733_v45  ;;  %v940_v11 = vrot.slane %v5771_v0, %v6733_v45 }
 0x18d   :  { %v770_v14 = vcombine.high %v768_v1, %v768_v1  ;;  %v791_v16 = vrot.slane %v769_v4, %v6733_v45  ;;  %v803_v17 = vcombine.high %v687_v5, %v687_v5  ;;  %v691_v18 = vpop.f32.mrb[6].mxu0  ;;  %v784_v7 = vrot.slane %v768_v1, %v6733_v45 }
 0x18e   :  { %v947_v19 = vrot.slane %v925_v9, %v6733_v45  ;;  %v954_v20 = vrot.slane %v5772_v10, %v6733_v45  ;;  %v810_v23 = vrot.slane %v687_v5, %v6733_v45  ;;  %v6052_v24 = vpop.f32.mrb[7].mxu0  ;;  %v955_v34 = vcombine.low %v933_v13, %v940_v11 }
 0x18f   :  { %v798_v3 = vrot.slane %v770_v14, %v6733_v45  ;;  %v972_v22 = vcombine.low %v777_v15, %v791_v16  ;;  %v5773_v25 = vcombine.high %v777_v15, %v791_v16  ;;  %v817_v26 = vrot.slane %v803_v17, %v6733_v45 }
 0x190   :  { %v956_v27 = vcombine.low %v947_v19, %v954_v20  ;;  %v818_v6 = vcombine.high %v810_v23, %v810_v23  ;;  %v826_v28 = vrot.slane %v810_v23, %v6733_v45  ;;  %v963_v49 = vrot.slane %v955_v34, %v6733_v45 }
 0x191   :  { %v974_v29 = vcombine.low %v784_v7, %v798_v3  ;;  %v5774_v30 = vcombine.high %v784_v7, %v798_v3  ;;  %v982_v31 = vrot.slane %v972_v22, %v6733_v45  ;;  %v989_v32 = vrot.slane %v5773_v25, %v6733_v45  ;;  %v696_v33 = vpop.f32.mrb[8].mxu0 }
 0x192   :  { %v819_v35 = vcombine.high %v817_v26, %v817_v26  ;;  %v833_v36 = vrot.slane %v817_v26, %v6733_v45  ;;  %v840_v37 = vrot.slane %v818_v6, %v6733_v45  ;;  %v6055_v38 = vpop.f32.mrb[9].mxu0  ;;  %v970_v41 = vrot.slane %v956_v27, %v6733_v45 }
 0x193   :  { %v996_v21 = vrot.slane %v974_v29, %v6733_v45  ;;  %v1003_v39 = vrot.slane %v5774_v30, %v6733_v45  ;;  %v1004_v40 = vcombine.low %v982_v31, %v989_v32  ;;  %v848_v47 = vcombine.high %v826_v28, %v826_v28 }
 0x194   :  { %v850_v42 = vcombine.high %v840_v37, %v840_v37  ;;  %v847_v46 = vrot.slane %v819_v35, %v6733_v45  ;;  %v1027_v48 = vrot.slane %v826_v28, %v6733_v45  ;;  %v849_v50 = vcombine.high %v833_v36, %v833_v36 }
 0x195   :  { %v1005_v44 = vcombine.low %v996_v21, %v1003_v39  ;;  %v692_v51 = vadd.f32 %v6828_v43, %v691_v18  ;;  %v1012_v52 = vrot.slane %v1004_v40, %v6733_v45  ;;  %v697_v58 = vadd.f32 %v6828_v43, %v696_v33 }
 0x196   :  { %v6866_v54 = vrot.slane %v1027_v48, %v6733_v45  ;;  %v1135_v55 = vcombine.low %v850_v42, %v833_v36  ;;  %v6870_v59 = vcombine.low %v963_v49, %v970_v41  ;;  %v1134_v61 = vcombine.low %v840_v37, %v848_v47 }
 0x197   :  { %v1019_v53 = vrot.slane %v1005_v44, %v6733_v45  ;;  %v852_v56 = vcombine.high %v692_v51, %v692_v51  ;;  %v859_v57 = vrot.slane %v692_v51, %v6733_v45  ;;  %v851_v62 = vcombine.high %v847_v46, %v847_v46 }
 0x198   :  { %1039 = vrot.lane.b32.xlu1 %v6866_v54, %s6625_s3  ;;  %v1136_v63 = vcombine.low %v847_v46, %v849_v50  ;;  %v1151_v4 = vrot.slane %v1135_v55, %v6733_v45  ;;  %v907_v13 = vrot.slane %v697_v58, %v6733_v45  ;;  %v1144_v15 = vrot.slane %v1134_v61, %v6733_v45 }
 0x199   :  { %v6872_v60 = vcombine.low %v1012_v52, %v1019_v53  ;;  %v866_v0 = vrot.slane %v852_v56, %v6733_v45  ;;  %v867_v1 = vcombine.high %v859_v57, %v859_v57  ;;  %v875_v2 = vrot.slane %v859_v57, %v6733_v45 }
 0x19a   :  { %v1158_v19 = vrot.slane %v1136_v63, %v6733_v45  ;;  %v1166_v20 = vcombine.low %v1144_v15, %v1151_v4  ;;  %v915_v25 = vrot.slane %v907_v13, %v6733_v45  ;;  %v908_v32 = vcombine.high %v907_v13, %v907_v13 }
 0x19b   :  { %v6881_v43 = vpack.i.bf16 %v6872_v60, %v6870_v59  ;;  %v868_v5 = vcombine.high %v866_v0, %v866_v0  ;;  %v882_v9 = vrot.slane %v866_v0, %v6733_v45  ;;  %v889_v10 = vrot.slane %v867_v1, %v6733_v45 }
 0x19c   :  { %v897_v11 = vcombine.high %v875_v2, %v875_v2  ;;  %v1137_v14 = vcombine.low %v851_v62, %v875_v2  ;;  %v1174_v29 = vrot.slane %v1166_v20, %v6733_v45  ;;  %v922_v38 = vrot.slane %v908_v32, %v6733_v45 }
 0x19d   :  { %6446 = vrot.lane.b32.xlu0 %v6881_v43, %s6625_s3  ;;  %v896_v16 = vrot.slane %v868_v5, %v6733_v45  ;;  %v898_v17 = vcombine.high %v882_v9, %v882_v9  ;;  %v899_v18 = vcombine.high %v889_v10, %v889_v10 }
 0x19e   :  { %v1165_v7 = vrot.slane %v1137_v14, %v6733_v45  ;;  %v1183_v23 = vcombine.low %v889_v10, %v897_v11  ;;  %v1238_v40 = vrot.slane %v922_v38, %v6733_v45 }
 0x19f   :  { %v1184_v24 = vcombine.low %v899_v18, %v882_v9  ;;  %v1185_v3 = vcombine.low %v896_v16, %v898_v17  ;;  %v900_v22 = vcombine.high %v896_v16, %v896_v16 }
 0x1a0   :  { %v1167_v26 = vcombine.low %v1158_v19, %v1165_v7  ;;  %v1193_v27 = vrot.slane %v1183_v23, %v6733_v45  ;;  %v6918_v42 = vrot.slane %v1238_v40, %v6733_v45 }
 0x1a1   :  { %6456 = vrot.lane.b32.xlu0 %v6881_v43, %s6626_s30  ;;  %v1200_v6 = vrot.slane %v1184_v24, %v6733_v45  ;;  %v1186_v28 = vcombine.low %v900_v22, %v915_v25  ;;  %v1207_v33 = vrot.slane %v1185_v3, %v6733_v45 }
 0x1a2   :  { %v1181_v30 = vrot.slane %v1167_v26, %v6733_v45 }
 0x1a3   :  { %v1215_v31 = vcombine.low %v1193_v27, %v1200_v6  ;;  %v1214_v34 = vrot.slane %v1186_v28, %v6733_v45 }
 0x1a4   :  { %v6901_v35 = vcombine.low %v1174_v29, %v1181_v30 }
 0x1a5   :  { %6461 = vrot.lane.b32.xlu0 %v6881_v43, %s6627_s8  ;;  %v1216_v36 = vcombine.low %v1207_v33, %v1214_v34  ;;  %v1223_v37 = vrot.slane %v1215_v31, %v6733_v45 }
 0x1a7   :  { %v1230_v21 = vrot.slane %v1216_v36, %v6733_v45 }
 0x1a9   :  { %v6908_v39 = vcombine.low %v1223_v37, %v1230_v21 }
 0x1ab   :  { %v6913_v41 = vpack.i.bf16 %v6908_v39, %v6901_v35 }
 0x1ad   :  { %6451 = vrot.lane.b32.xlu1 %v6913_v41, %s6625_s3 }
 0x1b1   :  { %1250 = vrot.lane.b32.xlu1 %v6918_v42, %s6625_s3 }
 0x1b5   :  { %1422 = vrot.lane.b32.xlu1 %v6866_v54, %s6626_s30 }
 0x20a   :  { %v1040_v55 = vpop.permute.xlu1 %1039 }
 0x20f   :  { %v6447_v44 = vpop.permute.xlu0 %6446 }
 0x210   :  { %v6449_v46 = vunpack.i.h.bf16 %v6447_v44  ;;  %v6448_v47 = vunpack.i.l.bf16 %v6447_v44 }
 0x212   :  { %v6371_v49 = vpack.c.bf16 %v6449_v46, %v6448_v47 }
 0x213   :  { %v6457_v50 = vpop.permute.xlu0 %6456 }
 0x214   :  { %v6459_v51 = vunpack.i.h.bf16 %v6457_v50  ;;  %v6458_v52 = vunpack.i.l.bf16 %v6457_v50  ;;  %6373 = vmatpush3.bf16.xpose.msk.msra.mxu1 %vm6926_vm4, %v6371_v49 }
 0x215   :  { %6060 = vmatprep.subr.mxu1 %v6623_v12 }
 0x216   :  { %v6379_v53 = vpack.c.bf16 %v6459_v51, %v6458_v52 }
 0x217   :  { %v6979_v24 = vpop.permute.xlu0 %6461 }
 0x218   :  { %6380 = vmatpush3.bf16.msra.mxu0 %v6379_v53 }
 0x219   :  { %6090 = vmatprep.subr.mxu0 %v6623_v12 }
 0x21c   :  { %6061 = vmatpush3.xpose.msk.msra.mxu1 %vm1041_vm3, %v1040_v55 }
 0x21d   :  { %6374 = vmatprep.subr.bf16.mxu1 %v6621_v8 }
 0x21f   :  { %6063 = vmatmul.mubr.msk.f32.vlgmr.msra.gmra.mrb[0].mxu1 %vm1041_vm3, %v6870_v59  ;;  %v6452_v56 = vpop.permute.xlu1 %6451 }
 0x220   :  { %6065 = vmatprep.mubr.msk.f32.mxu1 %vm6622_vm0, %v6623_v12  ;;  %v6454_v57 = vunpack.i.h.bf16 %v6452_v56  ;;  %v6453_v58 = vunpack.i.l.bf16 %v6452_v56 }
 0x222   :  { %v6375_v61 = vpack.c.bf16 %v6454_v57, %v6453_v58 }
 0x223   :  { %6066 = vmatmul.mubr.msk.f32.gmra.mrb[2].mxu1 %vm1041_vm3, %v6872_v60  ;;  %v1251_v62 = vpop.permute.xlu1 %1250 }
 0x224   :  { %6068 = vmatprep.mubr.msk.f32.mxu1 %vm6622_vm0, %v6623_v12  ;;  %6377 = vmatpush3.bf16.xpose.msk.msra.mxu1 %vm6926_vm4, %v6375_v61 }
 0x225   :  { %6075 = vmatprep.subr.mxu1 %v6623_v12 }
 0x227   :  { %6069 = vmatmul.mubr.msk.f32.gmra.mrb[4].mxu1 %vm1041_vm3, %v6866_v54  ;;  %v1423_v63 = vpop.permute.xlu1 %1422 }
 0x228   :  { %6077 = vmatprep.mubr.msk.f32.mxu1 %vm6622_vm0, %v6623_v12  ;;  %6091 = vmatpush3.msk.msra.mxu0 %vm124_vm2, %v1423_v63 }
 0x229   :  { %6384 = vmatprep.subr.bf16.mxu0 %v6621_v8 }
 0x22c   :  { %6076 = vmatpush3.xpose.msk.msra.mxu1 %vm1041_vm3, %v1251_v62 }
 0x22d   :  { %6381 = vmatprep.subr.bf16.mxu1 %v6621_v8 }
 0x22f   :  { %6078 = vmatmul.mubr.msk.f32.vlgmr.msra.gmra.mrb[6].mxu1 %vm1041_vm3, %v6901_v35 }
 0x230   :  { %6080 = vmatprep.mubr.msk.f32.mxu1 %vm6622_vm0, %v6623_v12 }
 0x233   :  { %6081 = vmatmul.mubr.msk.f32.gmra.mrb[8].mxu1 %vm1041_vm3, %v6908_v39 }
 0x234   :  { %6083 = vmatprep.mubr.msk.f32.mxu1 %vm6622_vm0, %v6623_v12 }
 0x237   :  { %6084 = vmatmul.mubr.msk.f32.gmra.mrb[10].mxu1 %vm1041_vm3, %v6918_v42 }
 0x238   :  { %6107 = vmatprep.mubr.msk.f32.mxu1 %vm6622_vm0, %v6623_v12 }
 0x2f2   :  { %v1120_v0 = vpop.f32.mrb[0].mxu1 }
 0x2f3   :  { %v6064_v1 = vpop.f32.mrb[1].mxu1  ;;  %v1345_v2 = vsel %vm1344_vm5, %v1120_v0, -inf }
 0x2f4   :  { %1346 = vmax.xlane.f32.xlu1 %v1345_v2 }
 0x2f6   :  { %v1125_v4 = vpop.f32.mrb[2].mxu1 }
 0x2f7   :  { %v6067_v5 = vpop.f32.mrb[3].mxu1  ;;  %v1348_v9 = vsel %vm1344_vm5, %v1125_v4, -inf }
 0x2f8   :  { %1349 = vmax.xlane.f32.xlu0 %v1348_v9  ;;  %v6464_v9 = vunpack.i.h.bf16 %v6979_v24 }
 0x2fa   :  { %v1130_v10 = vpop.f32.mrb[4].mxu1 }
 0x2fb   :  { %v6070_v13 = vpop.f32.mrb[5].mxu1  ;;  %v1352_v15 = vsel %vm1351_vm6, %v1130_v10, -inf }
 0x2fc   :  { %1353 = vmax.xlane.f32.xlu0 %v1352_v15 }
 0x302   :  { %v1330_v11 = vpop.f32.mrb[6].mxu1 }
 0x303   :  { %v6079_v14 = vpop.f32.mrb[7].mxu1  ;;  %v1355_v16 = vsel %vm1344_vm5, %v1330_v11, -inf }
 0x304   :  { %1356 = vmax.xlane.f32.xlu1 %v1355_v16 }
 0x306   :  { %v1335_v17 = vpop.f32.mrb[8].mxu1 }
 0x307   :  { %v6082_v18 = vpop.f32.mrb[9].mxu1  ;;  %v1358_v19 = vsel %vm1344_vm5, %v1335_v17, -inf }
 0x308   :  { %1359 = vmax.xlane.f32.xlu0 %v1358_v19 }
 0x30a   :  { %v1340_v20 = vpop.f32.mrb[10].mxu1 }
 0x30b   :  { %v6085_v7 = vpop.f32.mrb[11].mxu1  ;;  %v1361_v23 = vsel %vm1351_vm6, %v1340_v20, -inf }
 0x315   :  { %1521 = vrot.lane.b32.xlu1 %v6918_v42, %s6626_s30 }
 0x31e   :  { %6466 = vrot.lane.b32.xlu0 %v6913_v41, %s6626_s30 }
 0x339   :  { %1362 = vmax.xlane.f32.xlu1 %v1361_v23 }
 0x34a   :  { %6471 = vrot.lane.b32.xlu1 %v6913_v41, %s6627_s8 }
 0x381   :  { %v1347_v3 = vpop.xlane.xlu1 %1346 }
 0x382   :  { %v1364_v22 = vsub.f32 %v1120_v0, %v1347_v3 }
 0x384   :  { %v1370_v25 = vmul.f32 1.442695, %v1364_v22 }
 0x385   :  { %v1350_v26 = vpop.xlane.xlu0 %1349 }
 0x386   :  { %6525 = vpow2.f32 %v1370_v25  ;;  %v1365_v27 = vsub.f32 %v1125_v4, %v1350_v26 }
 0x388   :  { %v1372_v6 = vmul.f32 1.442695, %v1365_v27 }
 0x389   :  { %v1354_v30 = vpop.xlane.xlu0 %1353 }
 0x38a   :  { %6527 = vpow2.f32 %v1372_v6  ;;  %v1366_v44 = vsub.f32 %v1130_v10, %v1354_v30  ;;  %v6463_v10 = vunpack.i.l.bf16 %v6979_v24 }
 0x38c   :  { %v1374_v46 = vmul.f32 1.442695, %v1366_v44 }
 0x38e   :  { %6529 = vpow2.f32 %v1374_v46 }
 0x390   :  { %v6526_v28 = vpop.eup %6525 }
 0x391   :  { %v1382_v29 = vsel %vm1344_vm5, %v6526_v28, 0.0  ;;  %v1357_v38 = vpop.xlane.xlu1 %1356 }
 0x392   :  { %1383 = vadd.xlane.f32.xlu0 %v1382_v29  ;;  %v1367_v47 = vsub.f32 %v1330_v11, %v1357_v38  ;;  %v6385_v11 = vpack.c.bf16 %v6464_v9, %v6463_v10 }
 0x394   :  { %v6528_v31 = vpop.eup %6527  ;;  %v1376_v49 = vmul.f32 1.442695, %v1367_v47 }
 0x395   :  { %v1385_v32 = vsel %vm1344_vm5, %v6528_v31, 0.0  ;;  %v1360_v33 = vpop.xlane.xlu0 %1359  ;;  %v1522_v40 = vpop.permute.xlu1 %1521 }
 0x396   :  { %1386 = vadd.xlane.f32.xlu1 %v1385_v32  ;;  %v1368_v50 = vsub.f32 %v1335_v17, %v1360_v33  ;;  %6531 = vpow2.f32 %v1376_v49 }
 0x398   :  { %v1378_v51 = vmul.f32 1.442695, %v1368_v50  ;;  %v6530_v52 = vpop.eup %6529 }
 0x399   :  { %v6467_v34 = vpop.permute.xlu0 %6466  ;;  %v1388_v53 = vsel %vm1351_vm6, %v6530_v52, 0.0 }
 0x39a   :  { %v6469_v36 = vunpack.i.h.bf16 %v6467_v34  ;;  %v6468_v37 = vunpack.i.l.bf16 %v6467_v34  ;;  %6533 = vpow2.f32 %v1378_v51 }
 0x39c   :  { %v6382_v21 = vpack.c.bf16 %v6469_v36, %v6468_v37 }
 0x39e   :  { %6383 = vmatpush3.bf16.msra.mxu1 %v6382_v21 }
 0x39f   :  { %6105 = vmatprep.subr.mxu1 %v6623_v12 }
 0x3a0   :  { %v6532_v58 = vpop.eup %6531 }
 0x3a1   :  { %v1391_v61 = vsel %vm1344_vm5, %v6532_v58, 0.0 }
 0x3a2   :  { %6106 = vmatpush3.msk.msra.mxu1 %vm124_vm2, %v1522_v40 }
 0x3a3   :  { %6388 = vmatprep.subr.bf16.mxu1 %v6621_v8 }
 0x3a4   :  { %v6534_v62 = vpop.eup %6533 }
 0x3a5   :  { %v1394_v63 = vsel %vm1344_vm5, %v6534_v62, 0.0 }
 0x3a7   :  { %1849 = vrot.lane.b32.xlu1 %v6872_v60, %s6628_s9 }
 0x3a8   :  { %1857 = vrot.lane.b32.xlu0 %v6866_v54, %s6627_s8 }
 0x3ab   :  { %1961 = vrot.lane.b32.xlu1 %v6918_v42, %s6627_s8 }
 0x3c6   :  { %v1363_v55 = vpop.xlane.xlu1 %1362 }
 0x3c7   :  { %1389 = vadd.xlane.f32.xlu0 %v1388_v53  ;;  %v1369_v56 = vsub.f32 %v1340_v20, %v1363_v55 }
 0x3c9   :  { %v1380_v57 = vmul.f32 1.442695, %v1369_v56 }
 0x3ca   :  { %v6472_v2 = vpop.permute.xlu1 %6471 }
 0x3cb   :  { %6535 = vpow2.f32 %v1380_v57  ;;  %v6474_v22 = vunpack.i.h.bf16 %v6472_v2  ;;  %v6473_v25 = vunpack.i.l.bf16 %v6472_v2 }
 0x3cd   :  { %v6389_v29 = vpack.c.bf16 %v6474_v22, %v6473_v25 }
 0x3cf   :  { %1392 = vadd.xlane.f32.xlu1 %v1391_v61 }
 0x3d3   :  { %1395 = vadd.xlane.f32.xlu1 %v1394_v63 }
 0x3d5   :  { %v6995_v0 = vpop.eup %6535 }
 0x3d6   :  { %v1397_v1 = vsel %vm1351_vm6, %v6995_v0, 0.0 }
 0x3d7   :  { %1398 = vadd.xlane.f32.xlu1 %v1397_v1 }
 0x3dd   :  { %1847 = vrot.lane.b32.xlu0 %v6870_v59, %s6628_s9 }
 0x3e1   :  { %1851 = vrot.lane.b32.xlu0 %v6866_v54, %s6628_s9 }
 0x3e5   :  { %1951 = vrot.lane.b32.xlu0 %v6901_v35, %s6628_s9 }
 0x3e8   :  { %1953 = vrot.lane.b32.xlu1 %v6908_v39, %s6628_s9 }
 0x3e9   :  { %1955 = vrot.lane.b32.xlu0 %v6918_v42, %s6628_s9 }
 0x41f   :  { %v1384_v4 = vpop.xlane.xlu0 %1383 }
 0x420   :  { %6537 = vrcp.f32 %v1384_v4 }
 0x423   :  { %v1387_v5 = vpop.xlane.xlu1 %1386  ;;  %v1858_v17 = vpop.permute.xlu0 %1857 }
 0x424   :  { %6539 = vrcp.f32 %v1387_v5 }
 0x427   :  { %v1850_v18 = vpop.permute.xlu1 %1849 }
 0x42a   :  { %v6538_v13 = vpop.eup %6537 }
 0x42b   :  { %v7011_v15 = vmul.f32 %v6538_v13, %v6526_v28  ;;  %v1962_v20 = vpop.permute.xlu1 %1961 }
 0x42d   :  { %6093 = vmatmul.mubr.msk.f32.vlgmr.msra.gmra.mrb[10].mxu0 %vm1344_vm5, %v7011_v15 }
 0x42e   :  { %v6540_v14 = vpop.eup %6539  ;;  %6387 = vmatpush3.bf16.xpose.msk.msra.mxu0 %vm6926_vm4, %v6385_v11  ;;  %6095 = vmatprep.mubr.msk.f32.mxu0 %vm6622_vm0, %v6623_v12 }
 0x42f   :  { %v7019_v16 = vmul.f32 %v6540_v14, %v6528_v31  ;;  %6120 = vmatprep.subr.mxu0 %v6623_v12 }
 0x431   :  { %6096 = vmatmul.mubr.msk.f32.gmra.mrb[12].mxu0 %vm1344_vm5, %v7019_v16 }
 0x432   :  { %6098 = vmatprep.mubr.msk.f32.mxu0 %vm6622_vm0, %v6623_v12 }
 0x436   :  { %6121 = vmatpush3.xpose.msk.msra.mxu0 %vm1041_vm3, %v1858_v17 }
 0x437   :  { %6392 = vmatprep.subr.bf16.mxu0 %v6621_v8 }
 0x454   :  { %v1390_v19 = vpop.xlane.xlu0 %1389 }
 0x455   :  { %6541 = vrcp.f32 %v1390_v19 }
 0x458   :  { %v1848_v26 = vpop.permute.xlu0 %1847 }
 0x45c   :  { %v1393_v7 = vpop.xlane.xlu1 %1392  ;;  %v1852_v32 = vpop.permute.xlu0 %1851 }
 0x45d   :  { %6543 = vrcp.f32 %v1393_v7 }
 0x45f   :  { %v6542_v23 = vpop.eup %6541 }
 0x460   :  { %v1396_v24 = vpop.xlane.xlu1 %1395  ;;  %v7028_v3 = vmul.f32 %v6542_v23, %v6530_v52  ;;  %v1952_v36 = vpop.permute.xlu0 %1951 }
 0x461   :  { %6545 = vrcp.f32 %v1396_v24 }
 0x462   :  { %6099 = vmatmul.mubr.msk.f32.gmra.mrb[14].mxu0 %vm1344_vm5, %v7028_v3 }
 0x463   :  { %6122 = vmatprep.mubr.msk.f32.mxu0 %vm6622_vm0, %v6623_v12 }
 0x464   :  { %v1399_v27 = vpop.xlane.xlu1 %1398  ;;  %v1956_v38 = vpop.permute.xlu0 %1955 }
 0x465   :  { %6547 = vrcp.f32 %v1399_v27 }
 0x466   :  { %6123 = vmatmul.mubr.msk.f32.vlgmr.msra.gmra.mrb[16].mxu0 %vm1041_vm3, %v1848_v26 }
 0x467   :  { %v6544_v6 = vpop.eup %6543  ;;  %6125 = vmatprep.mubr.msk.f32.mxu0 %vm6622_vm0, %v6623_v12 }
 0x468   :  { %v7037_v28 = vmul.f32 %v6544_v6, %v6532_v58  ;;  %v1954_v37 = vpop.permute.xlu1 %1953 }
 0x46a   :  { %6108 = vmatmul.mubr.msk.f32.vlgmr.msra.gmra.mrb[12].mxu1 %vm1344_vm5, %v7037_v28  ;;  %6126 = vmatmul.mubr.msk.f32.gmra.mrb[18].mxu0 %vm1041_vm3, %v1850_v18 }
 0x46b   :  { %v6546_v30 = vpop.eup %6545  ;;  %6391 = vmatpush3.bf16.xpose.msk.msra.mxu1 %vm6926_vm4, %v6389_v29  ;;  %6110 = vmatprep.mubr.msk.f32.mxu1 %vm6622_vm0, %v6623_v12 }
 0x46c   :  { %6128 = vmatprep.mubr.msk.f32.mxu0 %vm6622_vm0, %v6623_v12  ;;  %v7048_v31 = vmul.f32 %v6546_v30, %v6534_v62  ;;  %6135 = vmatprep.subr.mxu1 %v6623_v12 }
 0x46e   :  { %6111 = vmatmul.mubr.msk.f32.gmra.mrb[14].mxu1 %vm1344_vm5, %v7048_v31  ;;  %6129 = vmatmul.mubr.msk.f32.gmra.mrb[20].mxu0 %vm1041_vm3, %v1852_v32 }
 0x46f   :  { %6113 = vmatprep.mubr.msk.f32.mxu1 %vm6622_vm0, %v6623_v12  ;;  %6152 = vmatprep.mubr.msk.f32.mxu0 %vm6622_vm0, %v6623_v12  ;;  %v6548_v33 = vpop.eup %6547 }
 0x470   :  { %v7059_v34 = vmul.f32 %v6548_v33, %v6995_v0 }
 0x472   :  { %6114 = vmatmul.mubr.msk.f32.gmra.mrb[16].mxu1 %vm1344_vm5, %v7059_v34 }
 0x473   :  { %6136 = vmatpush3.xpose.msk.msra.mxu1 %vm1041_vm3, %v1962_v20  ;;  %6137 = vmatprep.mubr.msk.f32.mxu1 %vm6622_vm0, %v6623_v12 }
 0x474   :  { %6426 = vmatprep.subr.bf16.mxu1 %v6621_v8 }
 0x476   :  { %6138 = vmatmul.mubr.msk.f32.vlgmr.msra.gmra.mrb[18].mxu1 %vm1041_vm3, %v1952_v36 }
 0x477   :  { %6140 = vmatprep.mubr.msk.f32.mxu1 %vm6622_vm0, %v6623_v12 }
 0x47a   :  { %6141 = vmatmul.mubr.msk.f32.gmra.mrb[20].mxu1 %vm1041_vm3, %v1954_v37 }
 0x47b   :  { %6143 = vmatprep.mubr.msk.f32.mxu1 %vm6622_vm0, %v6623_v12 }
 0x47e   :  { %6144 = vmatmul.mubr.msk.f32.gmra.mrb[22].mxu1 %vm1041_vm3, %v1956_v38 }
 0x47f   :  { %6170 = vmatprep.mubr.msk.f32.mxu1 %vm6622_vm0, %v6623_v12 }
 0x500   :  { %v7076_v21 = vpop.f32.mrb[10].mxu0 }
 0x501   :  { %v6094_v40 = vpop.f32.mrb[11].mxu0 }
 0x504   :  { %v7078_v44 = vpop.f32.mrb[12].mxu0 }
 0x505   :  { %v6097_v46 = vpop.f32.mrb[13].mxu0 }
 0x535   :  { %v1513_v47 = vpop.f32.mrb[14].mxu0 }
 0x536   :  { %v6100_v49 = vpop.f32.mrb[15].mxu0  ;;  %v1726_v53 = vrot.slane %v1513_v47, %v6733_v45 }
 0x538   :  { %v1733_v4 = vrot.slane %v1726_v53, %v6733_v45 }
 0x539   :  { %v7080_v50 = vpop.f32.mrb[16].mxu0 }
 0x53a   :  { %v6124_v51 = vpop.f32.mrb[17].mxu0  ;;  %v2055_v52 = vsel %vm1344_vm5, %v7080_v50, -inf }
 0x53b   :  { %2056 = vmax.xlane.f32.xlu1 %v2055_v52 }
 0x53d   :  { %v1602_v55 = vpop.f32.mrb[12].mxu1  ;;  %v7085_v56 = vpop.f32.mrb[18].mxu0 }
 0x53e   :  { %v1734_v57 = vcombine.high %v1602_v55, %v1602_v55  ;;  %v1741_v58 = vrot.slane %v1602_v55, %v6733_v45  ;;  %v6109_v61 = vpop.f32.mrb[13].mxu1  ;;  %v6127_v62 = vpop.f32.mrb[19].mxu0  ;;  %v2058_v63 = vsel %vm1344_vm5, %v7085_v56, -inf }
 0x53f   :  { %2059 = vmax.xlane.f32.xlu0 %v2058_v63 }
 0x540   :  { %v1748_v0 = vrot.slane %v1734_v57, %v6733_v45  ;;  %v1749_v1 = vcombine.high %v1741_v58, %v1741_v58  ;;  %v1757_v2 = vrot.slane %v1741_v58, %v6733_v45 }
 0x541   :  { %v1607_v5 = vpop.f32.mrb[14].mxu1  ;;  %v7093_v9 = vpop.f32.mrb[20].mxu0 }
 0x542   :  { %v1750_v10 = vcombine.high %v1748_v0, %v1748_v0  ;;  %v1764_v13 = vrot.slane %v1748_v0, %v6733_v45  ;;  %v1771_v11 = vrot.slane %v1749_v1, %v6733_v45  ;;  %v1779_v14 = vcombine.high %v1757_v2, %v1757_v2  ;;  %v6112_v17 = vpop.f32.mrb[15].mxu1  ;;  %v6130_v18 = vpop.f32.mrb[21].mxu0 }
 0x543   :  { %v2965_v19 = vcombine.low %v1733_v4, %v1757_v2  ;;  %v1783_v20 = vcombine.high %v1607_v5, %v1607_v5  ;;  %v1790_v7 = vrot.slane %v1607_v5, %v6733_v45  ;;  %v2061_v23 = vsel %vm1351_vm6, %v7093_v9, -inf }
 0x544   :  { %v1778_v24 = vrot.slane %v1750_v10, %v6733_v45  ;;  %v1780_v22 = vcombine.high %v1764_v13, %v1764_v13  ;;  %v1781_v25 = vcombine.high %v1771_v11, %v1771_v11  ;;  %v2966_v26 = vcombine.low %v1771_v11, %v1779_v14  ;;  %2062 = vmax.xlane.f32.xlu0 %v2061_v23 }
 0x545   :  { %v2975_v27 = vrot.slane %v2965_v19, %v6733_v45  ;;  %v1797_v6 = vrot.slane %v1783_v20, %v6733_v45  ;;  %v1798_v29 = vcombine.high %v1790_v7, %v1790_v7  ;;  %v1806_v30 = vrot.slane %v1790_v7, %v6733_v45  ;;  %v1612_v38 = vpop.f32.mrb[16].mxu1 }
 0x546   :  { %v2967_v32 = vcombine.low %v1781_v25, %v1764_v13  ;;  %v2968_v33 = vcombine.low %v1778_v24, %v1780_v22  ;;  %v2982_v36 = vrot.slane %v2966_v26, %v6733_v45  ;;  %v1782_v37 = vcombine.high %v1778_v24, %v1778_v24  ;;  %v6115_v51 = vpop.f32.mrb[17].mxu1 }
 0x547   :  { %v1799_v40 = vcombine.high %v1797_v6, %v1797_v6  ;;  %v1813_v46 = vrot.slane %v1797_v6, %v6733_v45  ;;  %v1820_v47 = vrot.slane %v1798_v29, %v6733_v45  ;;  %v1828_v49 = vcombine.high %v1806_v30, %v1806_v30 }
 0x548   :  { %v2989_v52 = vrot.slane %v2967_v32, %v6733_v45  ;;  %v2996_v53 = vrot.slane %v2968_v33, %v6733_v45  ;;  %v2997_v55 = vcombine.low %v2975_v27, %v2982_v36  ;;  %v3014_v57 = vcombine.low %v1782_v37, %v1806_v30 }
 0x549   :  { %v1827_v58 = vrot.slane %v1799_v40, %v6733_v45  ;;  %v1829_v61 = vcombine.high %v1813_v46, %v1813_v46  ;;  %v1830_v62 = vcombine.high %v1820_v47, %v1820_v47  ;;  %v3015_v63 = vcombine.low %v1820_v47, %v1828_v49  ;;  %v2041_v2 = vpop.f32.mrb[18].mxu1 }
 0x54a   :  { %v3024_v0 = vrot.slane %v3014_v57, %v6733_v45  ;;  %v1838_v1 = vrot.slane %v1612_v38, %v6733_v45  ;;  %v2998_v4 = vcombine.low %v2989_v52, %v2996_v53  ;;  %v6139_v14 = vpop.f32.mrb[19].mxu1  ;;  %v2064_v18 = vsel %vm1344_vm5, %v2041_v2, -inf }
 0x54b   :  { %v3016_v5 = vcombine.low %v1830_v62, %v1813_v46  ;;  %v3017_v10 = vcombine.low %v1827_v58, %v1829_v61  ;;  %v3031_v13 = vrot.slane %v3015_v63, %v6733_v45  ;;  %v1831_v11 = vcombine.high %v1827_v58, %v1827_v58  ;;  %2065 = vmax.xlane.f32.xlu1 %v2064_v18 }
 0x54c   :  { %v1845_v17 = vrot.slane %v1838_v1, %v6733_v45  ;;  %v3005_v19 = vrot.slane %v2997_v55, %v6733_v45  ;;  %v3012_v20 = vrot.slane %v2998_v4, %v6733_v45 }
 0x54d   :  { %v3038_v7 = vrot.slane %v3016_v5, %v6733_v45  ;;  %v3045_v23 = vrot.slane %v3017_v10, %v6733_v45  ;;  %v3046_v24 = vcombine.low %v3024_v0, %v3031_v13  ;;  %v2046_v25 = vpop.f32.mrb[20].mxu1 }
 0x54e   :  { %v7119_v22 = vcombine.low %v1831_v11, %v1845_v17  ;;  %v7121_v26 = vcombine.low %v3005_v19, %v3012_v20  ;;  %v6142_v27 = vpop.f32.mrb[21].mxu1  ;;  %v2067_v6 = vsel %vm1344_vm5, %v2046_v25, -inf }
 0x54f   :  { %v3047_v29 = vcombine.low %v3038_v7, %v3045_v23  ;;  %2068 = vmax.xlane.f32.xlu0 %v2067_v6  ;;  %v3054_v30 = vrot.slane %v3046_v24, %v6733_v45 }
 0x551   :  { %v3061_v32 = vrot.slane %v3047_v29, %v6733_v45  ;;  %v2051_v33 = vpop.f32.mrb[22].mxu1 }
 0x552   :  { %v6145_v36 = vpop.f32.mrb[23].mxu1  ;;  %v2070_v37 = vsel %vm1351_vm6, %v2051_v33, -inf }
 0x553   :  { %v7127_v38 = vcombine.low %v3054_v30, %v3061_v32  ;;  %2071 = vmax.xlane.f32.xlu1 %v2070_v37 }
 0x5c8   :  { %v2057_v40 = vpop.xlane.xlu1 %2056 }
 0x5c9   :  { %v2073_v46 = vsub.f32 %v7080_v50, %v2057_v40 }
 0x5cb   :  { %v2079_v47 = vmul.f32 1.442695, %v2073_v46 }
 0x5cc   :  { %v2060_v49 = vpop.xlane.xlu0 %2059 }
 0x5cd   :  { %6549 = vpow2.f32 %v2079_v47  ;;  %v2074_v51 = vsub.f32 %v7085_v56, %v2060_v49 }
 0x5cf   :  { %v2081_v52 = vmul.f32 1.442695, %v2074_v51  ;;  %v1622_v51 = vcombine.high %v7076_v21, %v7076_v21 }
 0x5d1   :  { %6551 = vpow2.f32 %v2081_v52  ;;  %v2063_v53 = vpop.xlane.xlu0 %2062  ;;  %v1636_v52 = vrot.slane %v1622_v51, %v6733_v45 }
 0x5d2   :  { %v2075_v55 = vsub.f32 %v7093_v9, %v2063_v53  ;;  %v1671_v53 = vcombine.high %v7078_v44, %v7078_v44 }
 0x5d4   :  { %v2083_v57 = vmul.f32 1.442695, %v2075_v55  ;;  %v1629_v55 = vrot.slane %v7076_v21, %v6733_v45 }
 0x5d6   :  { %6553 = vpow2.f32 %v2083_v57  ;;  %v1638_v57 = vcombine.high %v1636_v52, %v1636_v52 }
 0x5d7   :  { %v6550_v58 = vpop.eup %6549 }
 0x5d8   :  { %v2091_v61 = vsel %vm1344_vm5, %v6550_v58, 0.0  ;;  %v2066_v62 = vpop.xlane.xlu1 %2065 }
 0x5d9   :  { %2092 = vadd.xlane.f32.xlu0 %v2091_v61  ;;  %v2076_v50 = vsub.f32 %v2041_v2, %v2066_v62  ;;  %v1685_v61 = vrot.slane %v1671_v53, %v6733_v45  ;;  %v1637_v62 = vcombine.high %v1629_v55, %v1629_v55 }
 0x5db   :  { %v7133_v63 = vpop.eup %6551  ;;  %v2085_v1 = vmul.f32 1.442695, %v2076_v50  ;;  %v1666_v50 = vrot.slane %v1638_v57, %v6733_v45  ;;  %v1659_v21 = vrot.slane %v1637_v62, %v6733_v45 }
 0x5dc   :  { %v2094_v0 = vsel %vm1344_vm5, %v7133_v63, 0.0  ;;  %v2069_v2 = vpop.xlane.xlu0 %2068 }
 0x5dd   :  { %2095 = vadd.xlane.f32.xlu1 %v2094_v0  ;;  %6555 = vpow2.f32 %v2085_v1  ;;  %v2077_v10 = vsub.f32 %v2046_v25, %v2069_v2  ;;  %v1687_v1 = vcombine.high %v1685_v61, %v1685_v61 }
 0x5df   :  { %v2087_v13 = vmul.f32 1.442695, %v2077_v10 }
 0x5e0   :  { %v6554_v56 = vpop.eup %6553  ;;  %v2072_v11 = vpop.xlane.xlu1 %2071 }
 0x5e1   :  { %v2097_v4 = vsel %vm1351_vm6, %v6554_v56, 0.0  ;;  %6557 = vpow2.f32 %v2087_v13  ;;  %v2078_v14 = vsub.f32 %v2051_v33, %v2072_v11  ;;  %v1645_v13 = vrot.slane %v1629_v55, %v6733_v45 }
 0x5e2   :  { %2098 = vadd.xlane.f32.xlu0 %v2097_v4 }
 0x5e3   :  { %v2089_v17 = vmul.f32 1.442695, %v2078_v14 }
 0x5e5   :  { %6559 = vpow2.f32 %v2089_v17 }
 0x5e7   :  { %v7138_v9 = vpop.eup %6555 }
 0x5e8   :  { %v2100_v5 = vsel %vm1344_vm5, %v7138_v9, 0.0 }
 0x5e9   :  { %2101 = vadd.xlane.f32.xlu1 %v2100_v5  ;;  %v1652_v5 = vrot.slane %v1636_v52, %v6733_v45  ;;  %v1846_v52 = vld [vmem:[%s7886_s4] sm:$0xff] }
 0x5eb   :  { %v7144_v18 = vpop.eup %6557  ;;  %v2869_v11 = vcombine.low %v1652_v5, %v1666_v50 }
 0x5ec   :  { %v2103_v19 = vsel %vm1344_vm5, %v7144_v18, 0.0 }
 0x5ef   :  { %v7148_v20 = vpop.eup %6559 }
 0x5f0   :  { %v2106_v7 = vsel %vm1351_vm6, %v7148_v20, 0.0 }
 0x5f8   :  { %2131 = vrot.lane.b32.xlu0 %v6866_v54, %s6629_s10 }
 0x5fa   :  { %6476 = vrot.lane.b32.xlu1 %v6881_v43, %s6629_s10 }
 0x617   :  { %2104 = vadd.xlane.f32.xlu0 %v2103_v19  ;;  %v5825_v19 = vcombine.high %v1652_v5, %v1666_v50 }
 0x61e   :  { %2107 = vadd.xlane.f32.xlu1 %v2106_v7 }
 0x62d   :  { %6481 = vrot.lane.b32.xlu0 %v6913_v41, %s6629_s10 }
 0x62f   :  { %3282 = vrot.lane.b32.xlu1 %v6901_v35, %s6630_s11 }
 0x631   :  { %2230 = vrot.lane.b32.xlu0 %v6918_v42, %s6629_s10 }
 0x635   :  { %6486 = vrot.lane.b32.xlu0 %v6881_v43, %s6631_s12 }
 0x639   :  { %6491 = vrot.lane.b32.xlu0 %v6913_v41, %s6631_s12 }
 0x63d   :  { %3188 = vrot.lane.b32.xlu0 %v6866_v54, %s6631_s12 }
 0x641   :  { %3178 = vrot.lane.b32.xlu0 %v6870_v59, %s6630_s11 }
 0x645   :  { %3180 = vrot.lane.b32.xlu0 %v6872_v60, %s6630_s11 }
 0x649   :  { %3292 = vrot.lane.b32.xlu0 %v6918_v42, %s6631_s12 }
 0x64d   :  { %3182 = vrot.lane.b32.xlu0 %v6866_v54, %s6630_s11 }
 0x651   :  { %3284 = vrot.lane.b32.xlu0 %v6908_v39, %s6630_s11 }
 0x655   :  { %3286 = vrot.lane.b32.xlu0 %v6918_v42, %s6630_s11 }
 0x666   :  { %v2093_v23 = vpop.xlane.xlu0 %2092 }
 0x667   :  { %6561 = vrcp.f32 %v2093_v23  ;;  %v2867_v23 = vcombine.low %v1645_v13, %v1659_v21 }
 0x66a   :  { %v2096_v24 = vpop.xlane.xlu1 %2095 }
 0x66b   :  { %6563 = vrcp.f32 %v2096_v24 }
 0x66f   :  { %v2099_v27 = vpop.xlane.xlu0 %2098 }
 0x670   :  { %6565 = vrcp.f32 %v2099_v27  ;;  %v1701_v27 = vrot.slane %v1685_v61, %v6733_v45 }
 0x671   :  { %v6562_v33 = vpop.eup %6561 }
 0x672   :  { %v7165_v36 = vmul.f32 %v6562_v33, %v6550_v58 }
 0x673   :  { %v2132_v37 = vpop.permute.xlu0 %2131 }
 0x675   :  { %v6564_v40 = vpop.eup %6563 }
 0x676   :  { %v2102_v25 = vpop.xlane.xlu1 %2101  ;;  %v7174_v46 = vmul.f32 %v6564_v40, %v7133_v63  ;;  %v1678_v63 = vrot.slane %v7078_v44, %v6733_v45  ;;  %v1715_v44 = vrot.slane %v1687_v1, %v6733_v45  ;;  %v2898_v40 = vrot.slane %v5825_v19, %v6733_v45 }
 0x677   :  { %6567 = vrcp.f32 %v2102_v25  ;;  %v5824_v25 = vcombine.high %v1645_v13, %v1659_v21 }
 0x678   :  { %v1686_v2 = vcombine.high %v1678_v63, %v1678_v63  ;;  %v5827_v51 = vcombine.high %v1701_v27, %v1715_v44 }
 0x67a   :  { %v6477_v6 = vpop.permute.xlu1 %6476  ;;  %v6566_v47 = vpop.eup %6565  ;;  %v2947_v62 = vrot.slane %v5827_v51, %v6733_v45 }
 0x67b   :  { %v6479_v29 = vunpack.i.h.bf16 %v6477_v6  ;;  %v6478_v30 = vunpack.i.l.bf16 %v6477_v6  ;;  %v7180_v49 = vmul.f32 %v6566_v47, %v6554_v56  ;;  %v1708_v6 = vrot.slane %v1686_v2, %v6733_v45 }
 0x67c   :  { %v2918_v47 = vcombine.low %v1701_v27, %v1715_v44 }
 0x67d   :  { %v6393_v32 = vpack.c.bf16 %v6479_v29, %v6478_v30  ;;  %v2891_v29 = vrot.slane %v2869_v11, %v6733_v45  ;;  %v1694_v30 = vrot.slane %v1678_v63, %v6733_v45 }
 0x67e   :  { %v2940_v61 = vrot.slane %v2918_v47, %v6733_v45 }
 0x67f   :  { %6394 = vmatpush3.bf16.msra.mxu0 %v6393_v32  ;;  %v2916_v53 = vcombine.low %v1694_v30, %v1708_v6  ;;  %v5826_v55 = vcombine.high %v1694_v30, %v1708_v6 }
 0x680   :  { %6150 = vmatprep.subr.mxu0 %v6623_v12  ;;  %v2949_v21 = vcombine.low %v2940_v61, %v2947_v62 }
 0x681   :  { %v6568_v17 = vpop.eup %6567  ;;  %v2926_v50 = vrot.slane %v2916_v53, %v6733_v45 }
 0x682   :  { %v7208_v32 = vmul.f32 %v6568_v17, %v7138_v9  ;;  %v2877_v9 = vrot.slane %v2867_v23, %v6733_v45  ;;  %v2963_v19 = vrot.slane %v2949_v21, %v6733_v45 }
 0x683   :  { %6151 = vmatpush3.msk.msra.mxu0 %vm124_vm2, %v2132_v37 }
 0x684   :  { %6153 = vmatmul.mubr.msk.f32.vlgmr.msra.gmra.mrb[22].mxu0 %vm1344_vm5, %v7165_v36  ;;  %6395 = vmatprep.subr.bf16.mxu0 %v6621_v8 }
 0x685   :  { %6155 = vmatprep.mubr.msk.f32.mxu0 %vm6622_vm0, %v6623_v12 }
 0x688   :  { %6156 = vmatmul.mubr.msk.f32.gmra.mrb[24].mxu0 %vm1344_vm5, %v7174_v46 }
 0x689   :  { %6158 = vmatprep.mubr.msk.f32.mxu0 %vm6622_vm0, %v6623_v12 }
 0x68c   :  { %6159 = vmatmul.mubr.msk.f32.gmra.mrb[26].mxu0 %vm1344_vm5, %v7180_v49 }
 0x68d   :  { %6167 = vmatprep.mubr.msk.f32.mxu0 %vm6622_vm0, %v6623_v12 }
 0x6a4   :  { %v2105_v58 = vpop.xlane.xlu0 %2104 }
 0x6a5   :  { %6569 = vrcp.f32 %v2105_v58  ;;  %v2900_v58 = vcombine.low %v2891_v29, %v2898_v40  ;;  %v2555_v29 = vld [vmem:[%s7886_s4 + $0x8] sm:$0xff] }
 0x6a8   :  { %v6482_v0 = vpop.permute.xlu0 %6481 }
 0x6a9   :  { %v6484_v56 = vunpack.i.h.bf16 %v6482_v0  ;;  %v6483_v4 = vunpack.i.l.bf16 %v6482_v0  ;;  %v2933_v0 = vrot.slane %v5826_v55, %v6733_v45 }
 0x6ab   :  { %v6396_v10 = vpack.c.bf16 %v6484_v56, %v6483_v4  ;;  %v2108_v7 = vpop.xlane.xlu1 %2107  ;;  %v2914_v4 = vrot.slane %v2900_v58, %v6733_v45  ;;  %v2948_v11 = vcombine.low %v2926_v50, %v2933_v0 }
 0x6ac   :  { %v2231_v14 = vpop.permute.xlu0 %2230  ;;  %6571 = vrcp.f32 %v2108_v7 }
 0x6ad   :  { %6397 = vmatpush3.bf16.msra.mxu0 %v6396_v10  ;;  %6428 = vmatpush3.bf16.msra.mxu1 %v6396_v10 }
 0x6ae   :  { %6165 = vmatprep.subr.mxu0 %v6623_v12  ;;  %6427 = vmatprep.subr.mxu1 %v6623_v12 }
 0x6af   :  { %v6570_v24 = vpop.eup %6569 }
 0x6b0   :  { %v7211_v33 = vmul.f32 %v6570_v24, %v7144_v18  ;;  %v7213_v37 = vpop.permute.xlu0 %6486  ;;  %v2884_v18 = vrot.slane %v5824_v25, %v6733_v45  ;;  %v3070_v25 = vrot.slane %v7119_v22, %v6733_v45 }
 0x6b1   :  { %6166 = vmatpush3.msk.msra.mxu0 %vm124_vm2, %v2231_v14  ;;  %6429 = vmatpush3.msk.msra.mxu1 %vm124_vm2, %v2231_v14 }
 0x6b2   :  { %6168 = vmatmul.mubr.msk.f32.vlgmr.msra.gmra.mrb[28].mxu0 %vm1344_vm5, %v7208_v32  ;;  %6171 = vmatmul.mubr.msk.f32.vlgmr.msra.gmra.mrb[24].mxu1 %vm1344_vm5, %v7211_v33  ;;  %v2899_v63 = vcombine.low %v2877_v9, %v2884_v18  ;;  %v3077_v27 = vrot.slane %v3070_v25, %v6733_v45 }
 0x6b3   :  { %6193 = vmatprep.subr.mxu1 %v6623_v12  ;;  %6173 = vmatprep.mubr.msk.f32.mxu1 %vm6622_vm0, %v6623_v12 }
 0x6b4   :  { %v6492_v57 = vpop.permute.xlu0 %6491  ;;  %6194 = vmatpush3.msra.mxu1 %v1846_v52  ;;  %6176 = vmatprep.subr.mxu0 %v6623_v12  ;;  %v2907_v13 = vrot.slane %v2899_v63, %v6733_v45 }
 0x6b5   :  { %6402 = vmatprep.subr.bf16.mxu1 %v6621_v8  ;;  %6178 = vmatprep.mubr.msk.f32.mxu0 %vm6622_vm0, %v6623_v12  ;;  %v6494_v2 = vunpack.i.h.bf16 %v6492_v57  ;;  %v6493_v10 = vunpack.i.l.bf16 %v6492_v57 }
 0x6b6   :  { %v6572_v1 = vpop.eup %6571  ;;  %v2915_v17 = vcombine.low %v2907_v13, %v2914_v4  ;;  %6177 = vmatpush3.msra.mxu0 %v2555_v29 }
 0x6b7   :  { %v7242_v5 = vmul.f32 %v6572_v1, %v7148_v20  ;;  %v6403_v44 = vpack.c.bf16 %v6494_v2, %v6493_v10  ;;  %v2956_v20 = vrot.slane %v2948_v11, %v6733_v45  ;;  %6398 = vmatprep.subr.bf16.mxu0 %v6621_v8 }
 0x6b8   :  { %v7238_v56 = vpop.permute.xlu0 %3188 }
 0x6b9   :  { %6174 = vmatmul.mubr.msk.f32.gmra.mrb[26].mxu1 %vm1344_vm5, %v7242_v5  ;;  %v2964_v23 = vcombine.low %v2956_v20, %v2963_v19 }
 0x6ba   :  { %6195 = vmatprep.mubr.msk.f32.mxu1 %vm6622_vm0, %v6623_v12 }
 0x6bc   :  { %v7247_v14 = vpop.permute.xlu0 %3178 }
 0x6bd   :  { %6196 = vmatmul.mubr.msk.f32.vlgmr.msra.gmra.mrb[28].mxu1 %vm1041_vm3, %v2915_v17 }
 0x6be   :  { %6405 = vmatpush3.bf16.xpose.msk.msra.mxu1 %vm6926_vm4, %v6403_v44  ;;  %6198 = vmatprep.mubr.msk.f32.mxu1 %vm6622_vm0, %v6623_v12 }
 0x6bf   :  { %6229 = vmatprep.subr.mxu1 %v6623_v12 }
 0x6c0   :  { %v7256_v7 = vpop.permute.xlu0 %3180 }
 0x6c1   :  { %6199 = vmatmul.mubr.msk.f32.gmra.mrb[30].mxu1 %vm1041_vm3, %v2964_v23 }
 0x6c2   :  { %6201 = vmatprep.mubr.msk.f32.mxu1 %vm6622_vm0, %v6623_v12 }
 0x6c4   :  { %v3293_v24 = vpop.permute.xlu0 %3292 }
 0x6c5   :  { %6202 = vmatmul.mubr.msk.f32.gmra.mrb[32].mxu1 %vm1041_vm3, %v7121_v26  ;;  %v3283_v26 = vpop.permute.xlu1 %3282 }
 0x6c6   :  { %6230 = vmatpush3.xpose.msk.msra.mxu1 %vm1041_vm3, %v3293_v24  ;;  %6204 = vmatprep.mubr.msk.f32.mxu1 %vm6622_vm0, %v6623_v12 }
 0x6c7   :  { %6409 = vmatprep.subr.bf16.mxu1 %v6621_v8 }
 0x6c8   :  { %v7277_v6 = vpop.permute.xlu0 %3182 }
 0x6c9   :  { %6205 = vmatmul.mubr.msk.f32.gmra.mrb[34].mxu1 %vm1041_vm3, %v7127_v38 }
 0x6ca   :  { %6207 = vmatprep.mubr.msk.f32.mxu1 %vm6622_vm0, %v6623_v12 }
 0x6cc   :  { %v3285_v22 = vpop.permute.xlu0 %3284 }
 0x6cd   :  { %6208 = vmatmul.mubr.msk.f32.gmra.mrb[36].mxu1 %vm1041_vm3, %v3077_v27 }
 0x6ce   :  { %6231 = vmatprep.mubr.msk.f32.mxu1 %vm6622_vm0, %v6623_v12 }
 0x6d0   :  { %v3287_v38 = vpop.permute.xlu0 %3286 }
 0x6d1   :  { %6232 = vmatmul.mubr.msk.f32.vlgmr.msra.gmra.mrb[38].mxu1 %vm1041_vm3, %v3283_v26 }
 0x6d2   :  { %6234 = vmatprep.mubr.msk.f32.mxu1 %vm6622_vm0, %v6623_v12 }
 0x6d5   :  { %6235 = vmatmul.mubr.msk.f32.gmra.mrb[40].mxu1 %vm1041_vm3, %v3285_v22 }
 0x6d6   :  { %6237 = vmatprep.mubr.msk.f32.mxu1 %vm6622_vm0, %v6623_v12 }
 0x6d9   :  { %6238 = vmatmul.mubr.msk.f32.gmra.mrb[42].mxu1 %vm1041_vm3, %v3287_v38 }
 0x6da   :  { %6261 = vmatprep.mubr.msk.f32.mxu1 %vm6622_vm0, %v6623_v12 }
 0x757   :  { %v2212_v30 = vpop.f32.mrb[22].mxu0 }
 0x758   :  { %v2331_v40 = vcombine.high %v2212_v30, %v2212_v30  ;;  %v2338_v47 = vrot.slane %v2212_v30, %v6733_v45  ;;  %v6154_v51 = vpop.f32.mrb[23].mxu0  ;;  %v6489_v30 = vunpack.i.h.bf16 %v7213_v37 }
 0x75a   :  { %v2345_v52 = vrot.slane %v2331_v40, %v6733_v45  ;;  %v2346_v9 = vcombine.high %v2338_v47, %v2338_v47  ;;  %v2354_v55 = vrot.slane %v2338_v47, %v6733_v45  ;;  %v6488_v40 = vunpack.i.l.bf16 %v7213_v37 }
 0x75b   :  { %v2217_v18 = vpop.f32.mrb[24].mxu0 }
 0x75c   :  { %v2347_v53 = vcombine.high %v2345_v52, %v2345_v52  ;;  %v2368_v57 = vrot.slane %v2346_v9, %v6733_v45  ;;  %v2380_v58 = vcombine.high %v2217_v18, %v2217_v18  ;;  %v6157_v61 = vpop.f32.mrb[25].mxu0  ;;  %v2361_v62 = vrot.slane %v2345_v52, %v6733_v45 }
 0x75d   :  { %v2387_v63 = vrot.slane %v2217_v18, %v6733_v45 }
 0x75e   :  { %v2375_v50 = vrot.slane %v2347_v53, %v6733_v45  ;;  %v2556_v0 = vcombine.low %v2354_v55, %v2368_v57  ;;  %v5815_v1 = vcombine.high %v2354_v55, %v2368_v57  ;;  %v2394_v4 = vrot.slane %v2380_v58, %v6733_v45 }
 0x75f   :  { %v2395_v21 = vcombine.high %v2387_v63, %v2387_v63  ;;  %v2222_v2 = vpop.f32.mrb[26].mxu0  ;;  %v2403_v20 = vrot.slane %v2387_v63, %v6733_v45  ;;  %v6399_v63 = vpack.c.bf16 %v6489_v30, %v6488_v40 }
 0x760   :  { %v2558_v10 = vcombine.low %v2361_v62, %v2375_v50  ;;  %v5816_v13 = vcombine.high %v2361_v62, %v2375_v50  ;;  %v2566_v11 = vrot.slane %v2556_v0, %v6733_v45  ;;  %v2573_v17 = vrot.slane %v5815_v1, %v6733_v45  ;;  %v6160_v19 = vpop.f32.mrb[27].mxu0 }
 0x761   :  { %v2396_v44 = vcombine.high %v2394_v4, %v2394_v4  ;;  %v2417_v23 = vrot.slane %v2395_v21, %v6733_v45  ;;  %v2410_v26 = vrot.slane %v2394_v4, %v6733_v45  ;;  %v2435_v4 = vrot.slane %v2222_v2, %v6733_v45 }
 0x762   :  { %v2580_v24 = vrot.slane %v2558_v10, %v6733_v45  ;;  %v2587_v25 = vrot.slane %v5816_v13, %v6733_v45  ;;  %v2588_v27 = vcombine.low %v2566_v11, %v2573_v17 }
 0x763   :  { %v2424_v22 = vrot.slane %v2396_v44, %v6733_v45  ;;  %v2605_v38 = vcombine.low %v2403_v20, %v2417_v23  ;;  %v5817_v29 = vcombine.high %v2403_v20, %v2417_v23 }
 0x764   :  { %v2589_v47 = vcombine.low %v2580_v24, %v2587_v25  ;;  %v2596_v53 = vrot.slane %v2588_v27, %v6733_v45  ;;  %v2442_v27 = vrot.slane %v2435_v4, %v6733_v45 }
 0x765   :  { %v2607_v51 = vcombine.low %v2410_v26, %v2424_v22  ;;  %v5818_v52 = vcombine.high %v2410_v26, %v2424_v22  ;;  %v2615_v9 = vrot.slane %v2605_v38, %v6733_v45  ;;  %v2622_v18 = vrot.slane %v5817_v29, %v6733_v45 }
 0x766   :  { %v2603_v55 = vrot.slane %v2589_v47, %v6733_v45 }
 0x767   :  { %v2629_v57 = vrot.slane %v2607_v51, %v6733_v45  ;;  %v2636_v58 = vrot.slane %v5818_v52, %v6733_v45  ;;  %v2637_v61 = vcombine.low %v2615_v9, %v2622_v18 }
 0x768   :  { %v2604_v62 = vcombine.low %v2596_v53, %v2603_v55 }
 0x769   :  { %v2638_v50 = vcombine.low %v2629_v57, %v2636_v58  ;;  %v2645_v37 = vrot.slane %v2637_v61, %v6733_v45 }
 0x76a   :  { %6179 = vmatmul.mubr.msk.f32.vlgmr.msra.gmra.mrb[30].mxu0 %vm1041_vm3, %v2604_v62 }
 0x76b   :  { %6401 = vmatpush3.bf16.xpose.msk.msra.mxu0 %vm6926_vm4, %v6399_v63  ;;  %6181 = vmatprep.mubr.msk.f32.mxu0 %vm6622_vm0, %v6623_v12  ;;  %v2652_v0 = vrot.slane %v2638_v50, %v6733_v45 }
 0x76c   :  { %6214 = vmatprep.subr.mxu0 %v6623_v12 }
 0x76d   :  { %v2653_v1 = vcombine.low %v2645_v37, %v2652_v0 }
 0x76f   :  { %6182 = vmatmul.mubr.msk.f32.gmra.mrb[32].mxu0 %vm1041_vm3, %v2653_v1 }
 0x770   :  { %6184 = vmatprep.mubr.msk.f32.mxu0 %vm6622_vm0, %v6623_v12 }
 0x773   :  { %6215 = vmatpush3.xpose.msk.msra.mxu0 %vm1041_vm3, %v7238_v56 }
 0x774   :  { %6406 = vmatprep.subr.bf16.mxu0 %v6621_v8 }
 0x785   :  { %v2311_v21 = vpop.f32.mrb[28].mxu0  ;;  %v2316_v10 = vpop.f32.mrb[24].mxu1 }
 0x786   :  { %v2443_v13 = vcombine.high %v2311_v21, %v2311_v21  ;;  %v2450_v11 = vrot.slane %v2311_v21, %v6733_v45  ;;  %v2492_v17 = vcombine.high %v2316_v10, %v2316_v10  ;;  %v2499_v19 = vrot.slane %v2316_v10, %v6733_v45  ;;  %v6169_v44 = vpop.f32.mrb[29].mxu0  ;;  %v6172_v20 = vpop.f32.mrb[25].mxu1 }
 0x788   :  { %v2457_v23 = vrot.slane %v2443_v13, %v6733_v45  ;;  %v2458_v24 = vcombine.high %v2450_v11, %v2450_v11  ;;  %v2466_v25 = vrot.slane %v2450_v11, %v6733_v45  ;;  %v2506_v56 = vrot.slane %v2492_v17, %v6733_v45 }
 0x789   :  { %v2507_v2 = vcombine.high %v2499_v19, %v2499_v19  ;;  %v2515_v26 = vrot.slane %v2499_v19, %v6733_v45 }
 0x78a   :  { %v2459_v22 = vcombine.high %v2457_v23, %v2457_v23  ;;  %v2473_v38 = vrot.slane %v2457_v23, %v6733_v45  ;;  %v2480_v29 = vrot.slane %v2458_v24, %v6733_v45  ;;  %v2488_v30 = vcombine.high %v2466_v25, %v2466_v25 }
 0x78b   :  { %v2654_v40 = vcombine.low %v2442_v27, %v2466_v25  ;;  %v2508_v47 = vcombine.high %v2506_v56, %v2506_v56  ;;  %v2522_v51 = vrot.slane %v2506_v56, %v6733_v45  ;;  %v2529_v52 = vrot.slane %v2507_v2, %v6733_v45 }
 0x78c   :  { %v2487_v9 = vrot.slane %v2459_v22, %v6733_v45  ;;  %v2489_v18 = vcombine.high %v2473_v38, %v2473_v38  ;;  %v2490_v53 = vcombine.high %v2480_v29, %v2480_v29  ;;  %v2655_v55 = vcombine.low %v2480_v29, %v2488_v30  ;;  %v2321_v1 = vpop.f32.mrb[26].mxu1 }
 0x78d   :  { %v2664_v57 = vrot.slane %v2654_v40, %v6733_v45  ;;  %v2536_v58 = vrot.slane %v2508_v47, %v6733_v45  ;;  %v2537_v61 = vcombine.high %v2515_v26, %v2515_v26  ;;  %v2538_v62 = vcombine.high %v2522_v51, %v2522_v51  ;;  %v6175_v13 = vpop.f32.mrb[27].mxu1 }
 0x78e   :  { %v2656_v63 = vcombine.low %v2490_v53, %v2473_v38  ;;  %v2657_v50 = vcombine.low %v2487_v9, %v2489_v18  ;;  %v2671_v37 = vrot.slane %v2655_v55, %v6733_v45  ;;  %v2491_v0 = vcombine.high %v2487_v9, %v2487_v9 }
 0x78f   :  { %v2539_v4 = vcombine.high %v2529_v52, %v2529_v52  ;;  %v2704_v21 = vcombine.low %v2529_v52, %v2537_v61  ;;  %v2706_v10 = vcombine.low %v2536_v58, %v2538_v62  ;;  %v2547_v24 = vrot.slane %v2321_v1, %v6733_v45 }
 0x790   :  { %v2678_v11 = vrot.slane %v2656_v63, %v6733_v45  ;;  %v2685_v17 = vrot.slane %v2657_v50, %v6733_v45  ;;  %v2686_v19 = vcombine.low %v2664_v57, %v2671_v37  ;;  %v2703_v44 = vcombine.low %v2491_v0, %v2515_v26  ;;  %v3154_v27 = vpop.f32.mrb[28].mxu1 }
 0x791   :  { %v2705_v20 = vcombine.low %v2539_v4, %v2522_v51  ;;  %v2734_v23 = vrot.slane %v2706_v10, %v6733_v45  ;;  %v2720_v56 = vrot.slane %v2704_v21, %v6733_v45  ;;  %v2540_v38 = vcombine.high %v2536_v58, %v2536_v58  ;;  %v6197_v30 = vpop.f32.mrb[29].mxu1 }
 0x792   :  { %v2713_v25 = vrot.slane %v2703_v44, %v6733_v45  ;;  %v2687_v2 = vcombine.low %v2678_v11, %v2685_v17  ;;  %v2554_v29 = vrot.slane %v2547_v24, %v6733_v45  ;;  %v2694_v26 = vrot.slane %v2686_v19, %v6733_v45 }
 0x793   :  { %v2727_v22 = vrot.slane %v2705_v20, %v6733_v45 }
 0x794   :  { %v2735_v40 = vcombine.low %v2713_v25, %v2720_v56  ;;  %v2701_v47 = vrot.slane %v2687_v2, %v6733_v45  ;;  %v2752_v51 = vcombine.low %v2540_v38, %v2554_v29  ;;  %v3159_v9 = vpop.f32.mrb[30].mxu1 }
 0x795   :  { %v2736_v52 = vcombine.low %v2727_v22, %v2734_v23  ;;  %v6200_v55 = vpop.f32.mrb[31].mxu1 }
 0x796   :  { %v2702_v18 = vcombine.low %v2694_v26, %v2701_v47  ;;  %v2743_v53 = vrot.slane %v2735_v40, %v6733_v45  ;;  %v2759_v61 = vrot.slane %v2752_v51, %v6733_v45 }
 0x797   :  { %v2750_v57 = vrot.slane %v2736_v52, %v6733_v45 }
 0x798   :  { %6185 = vmatmul.mubr.msk.f32.gmra.mrb[34].mxu0 %vm1041_vm3, %v2702_v18  ;;  %v3164_v62 = vpop.f32.mrb[32].mxu1  ;;  %v2766_v37 = vrot.slane %v2759_v61, %v6733_v45 }
 0x799   :  { %6187 = vmatprep.mubr.msk.f32.mxu0 %vm6622_vm0, %v6623_v12  ;;  %v2751_v58 = vcombine.low %v2743_v53, %v2750_v57  ;;  %v6203_v63 = vpop.f32.mrb[33].mxu1 }
 0x79c   :  { %6188 = vmatmul.mubr.msk.f32.gmra.mrb[36].mxu0 %vm1041_vm3, %v2751_v58  ;;  %v3169_v50 = vpop.f32.mrb[34].mxu1 }
 0x79d   :  { %6190 = vmatprep.mubr.msk.f32.mxu0 %vm6622_vm0, %v6623_v12  ;;  %v6206_v0 = vpop.f32.mrb[35].mxu1 }
 0x7a0   :  { %6191 = vmatmul.mubr.msk.f32.gmra.mrb[38].mxu0 %vm1041_vm3, %v2766_v37  ;;  %v3174_v1 = vpop.f32.mrb[36].mxu1 }
 0x7a1   :  { %6216 = vmatprep.mubr.msk.f32.mxu0 %vm6622_vm0, %v6623_v12  ;;  %v6209_v4 = vpop.f32.mrb[37].mxu1 }
 0x7a4   :  { %6217 = vmatmul.mubr.msk.f32.vlgmr.msra.gmra.mrb[40].mxu0 %vm1041_vm3, %v7247_v14  ;;  %v3372_v21 = vpop.f32.mrb[38].mxu1 }
 0x7a5   :  { %6219 = vmatprep.mubr.msk.f32.mxu0 %vm6622_vm0, %v6623_v12  ;;  %v6233_v10 = vpop.f32.mrb[39].mxu1 }
 0x7a8   :  { %6220 = vmatmul.mubr.msk.f32.gmra.mrb[42].mxu0 %vm1041_vm3, %v7256_v7  ;;  %v3377_v13 = vpop.f32.mrb[40].mxu1 }
 0x7a9   :  { %6222 = vmatprep.mubr.msk.f32.mxu0 %vm6622_vm0, %v6623_v12  ;;  %v6236_v11 = vpop.f32.mrb[41].mxu1  ;;  %v3398_v57 = vsel %vm1344_vm5, %v3377_v13, -inf }
 0x7ac   :  { %6223 = vmatmul.mubr.msk.f32.gmra.mrb[44].mxu0 %vm1041_vm3, %v7277_v6  ;;  %v3382_v14 = vpop.f32.mrb[42].mxu1 }
 0x7ad   :  { %6246 = vmatprep.mubr.msk.f32.mxu0 %vm6622_vm0, %v6623_v12  ;;  %v6239_v17 = vpop.f32.mrb[43].mxu1  ;;  %v3401_v61 = vsel %vm1351_vm6, %v3382_v14, -inf }
 0x83d   :  { %v2843_v19 = vpop.f32.mrb[30].mxu0 }
 0x83e   :  { %v7384_v44 = vadd.f32 %v3154_v27, %v2843_v19  ;;  %v6180_v20 = vpop.f32.mrb[31].mxu0 }
 0x842   :  { %v2848_v23 = vpop.f32.mrb[32].mxu0 }
 0x843   :  { %v7386_v24 = vadd.f32 %v3159_v9, %v2848_v23  ;;  %v6183_v7 = vpop.f32.mrb[33].mxu0  ;;  %v3395_v9 = vsel %vm1344_vm5, %v3372_v21, -inf }
 0x86b   :  { %v2853_v25 = vpop.f32.mrb[34].mxu0 }
 0x86c   :  { %v7388_v56 = vadd.f32 %v3164_v62, %v2853_v25  ;;  %v6186_v2 = vpop.f32.mrb[35].mxu0 }
 0x86f   :  { %v2858_v22 = vpop.f32.mrb[36].mxu0 }
 0x870   :  { %v7390_v38 = vadd.f32 %v3169_v50, %v2858_v22  ;;  %v6189_v6 = vpop.f32.mrb[37].mxu0 }
 0x873   :  { %v2863_v29 = vpop.f32.mrb[38].mxu0 }
 0x874   :  { %v7392_v30 = vadd.f32 %v3174_v1, %v2863_v29  ;;  %v6192_v40 = vpop.f32.mrb[39].mxu0 }
 0x877   :  { %v7394_v26 = vpop.f32.mrb[40].mxu0 }
 0x878   :  { %v6218_v27 = vpop.f32.mrb[41].mxu0  ;;  %v3386_v47 = vsel %vm1344_vm5, %v7394_v26, -inf }
 0x879   :  { %3387 = vmax.xlane.f32.xlu0 %v3386_v47 }
 0x87b   :  { %v3273_v51 = vpop.f32.mrb[42].mxu0 }
 0x87c   :  { %v6221_v52 = vpop.f32.mrb[43].mxu0  ;;  %v3389_v18 = vsel %vm1344_vm5, %v3273_v51, -inf }
 0x87d   :  { %3396 = vmax.xlane.f32.xlu0 %v3395_v9  ;;  %3390 = vmax.xlane.f32.xlu1 %v3389_v18 }
 0x87f   :  { %v3278_v53 = vpop.f32.mrb[44].mxu0 }
 0x880   :  { %v6224_v55 = vpop.f32.mrb[45].mxu0  ;;  %v3392_v58 = vsel %vm1351_vm6, %v3278_v53, -inf }
 0x881   :  { %3399 = vmax.xlane.f32.xlu1 %v3398_v57  ;;  %3393 = vmax.xlane.f32.xlu0 %v3392_v58 }
 0x885   :  { %3402 = vmax.xlane.f32.xlu0 %v3401_v61 }
 0x89b   :  { %6496 = vrot.lane.b32.xlu0 %v6881_v43, %s6632_s17 }
 0x906   :  { %v3388_v62 = vpop.xlane.xlu0 %3387 }
 0x907   :  { %v3404_v63 = vsub.f32 %v7394_v26, %v3388_v62 }
 0x909   :  { %v3410_v55 = vmul.f32 1.442695, %v3404_v63 }
 0x90a   :  { %v3397_v50 = vpop.xlane.xlu0 %3396  ;;  %v3391_v37 = vpop.xlane.xlu1 %3390 }
 0x90b   :  { %v3407_v0 = vsub.f32 %v3372_v21, %v3397_v50  ;;  %v3405_v1 = vsub.f32 %v3273_v51, %v3391_v37 }
 0x90d   :  { %v3416_v4 = vmul.f32 1.442695, %v3407_v0  ;;  %v3412_v10 = vmul.f32 1.442695, %v3405_v1  ;;  %v2124_v1 = vadd.f32 %v7208_v32, %v7037_v28  ;;  %v2125_v32 = vadd.f32 %v7211_v33, %v7048_v31 }
 0x90e   :  { %v3400_v11 = vpop.xlane.xlu1 %3399  ;;  %v3394_v17 = vpop.xlane.xlu0 %3393 }
 0x90f   :  { %6573 = vpow2.f32 %v3416_v4  ;;  %v3408_v19 = vsub.f32 %v3377_v13, %v3400_v11  ;;  %v3406_v20 = vsub.f32 %v3278_v53, %v3394_v17  ;;  %v2122_v17 = vadd.f32 %v7174_v46, %v7019_v16 }
 0x910   :  { %6575 = vpow2.f32 %v3412_v10  ;;  %v2123_v16 = vadd.f32 %v7180_v49, %v7028_v3 }
 0x911   :  { %v3418_v23 = vmul.f32 1.442695, %v3408_v19  ;;  %v3414_v7 = vmul.f32 1.442695, %v3406_v20 }
 0x912   :  { %v3403_v25 = vpop.xlane.xlu0 %3402 }
 0x913   :  { %6577 = vpow2.f32 %v3418_v23  ;;  %v3409_v2 = vsub.f32 %v3382_v14, %v3403_v25 }
 0x914   :  { %6579 = vpow2.f32 %v3414_v7 }
 0x915   :  { %v3420_v22 = vmul.f32 1.442695, %v3409_v2 }
 0x916   :  { %v6497_v6 = vpop.permute.xlu0 %6496 }
 0x917   :  { %6581 = vpow2.f32 %v3420_v22  ;;  %v6499_v29 = vunpack.i.h.bf16 %v6497_v6  ;;  %v6498_v21 = vunpack.i.l.bf16 %v6497_v6 }
 0x918   :  { %6583 = vpow2.f32 %v3410_v55 }
 0x919   :  { %v6574_v40 = vpop.eup %6573  ;;  %v6407_v26 = vpack.c.bf16 %v6499_v29, %v6498_v21  ;;  %v2126_v29 = vadd.f32 %v7242_v5, %v7059_v34  ;;  %v2121_v5 = vadd.f32 %v7165_v36, %v7011_v15 }
 0x91a   :  { %v6576_v27 = vpop.eup %6575  ;;  %v3431_v47 = vsel %vm1344_vm5, %v6574_v40, 0.0 }
 0x91b   :  { %3432 = vadd.xlane.f32.xlu1 %v3431_v47  ;;  %v3425_v13 = vsel %vm1344_vm5, %v6576_v27, 0.0  ;;  %6408 = vmatpush3.bf16.msra.mxu0 %v6407_v26 }
 0x91c   :  { %3426 = vadd.xlane.f32.xlu0 %v3425_v13  ;;  %6244 = vmatprep.subr.mxu0 %v6623_v12 }
 0x91d   :  { %v6578_v51 = vpop.eup %6577 }
 0x91e   :  { %v6580_v14 = vpop.eup %6579  ;;  %v3434_v52 = vsel %vm1344_vm5, %v6578_v51, 0.0 }
 0x91f   :  { %3435 = vadd.xlane.f32.xlu1 %v3434_v52  ;;  %v3428_v9 = vsel %vm1351_vm6, %v6580_v14, 0.0 }
 0x920   :  { %3429 = vadd.xlane.f32.xlu0 %v3428_v9 }
 0x921   :  { %v6582_v18 = vpop.eup %6581 }
 0x922   :  { %v3437_v53 = vsel %vm1351_vm6, %v6582_v18, 0.0  ;;  %v7421_v57 = vpop.eup %6583 }
 0x923   :  { %3438 = vadd.xlane.f32.xlu1 %v3437_v53  ;;  %v3422_v58 = vsel %vm1344_vm5, %v7421_v57, 0.0 }
 0x934   :  { %3462 = vrot.lane.b32.xlu1 %v6866_v54, %s6632_s17 }
 0x936   :  { %6501 = vrot.lane.b32.xlu0 %v6913_v41, %s6632_s17 }
 0x93a   :  { %6506 = vrot.lane.b32.xlu0 %v6881_v43, %s6633_s18 }
 0x93e   :  { %4213 = vrot.lane.b32.xlu0 %v6866_v54, %s6633_s18 }
 0x942   :  { %4205 = vrot.lane.b32.xlu0 %v6872_v60, %s6634_s19 }
 0x946   :  { %4307 = vrot.lane.b32.xlu0 %v6901_v35, %s6634_s19 }
 0x94a   :  { %4309 = vrot.lane.b32.xlu0 %v6908_v39, %s6634_s19 }
 0x958   :  { %3423 = vadd.xlane.f32.xlu1 %v3422_v58 }
 0x969   :  { %3561 = vrot.lane.b32.xlu1 %v6918_v42, %s6632_s17 }
 0x96d   :  { %6511 = vrot.lane.b32.xlu1 %v6913_v41, %s6633_s18 }
 0x971   :  { %4203 = vrot.lane.b32.xlu1 %v6870_v59, %s6634_s19 }
 0x975   :  { %4317 = vrot.lane.b32.xlu1 %v6918_v42, %s6633_s18 }
 0x979   :  { %4207 = vrot.lane.b32.xlu1 %v6866_v54, %s6634_s19 }
 0x97d   :  { %4311 = vrot.lane.b32.xlu1 %v6918_v42, %s6634_s19 }
 0x9a8   :  { %v3433_v60 = vpop.xlane.xlu1 %3432 }
 0x9a9   :  { %6585 = vrcp.f32 %v3433_v60  ;;  %v3427_v35 = vpop.xlane.xlu0 %3426 }
 0x9aa   :  { %6587 = vrcp.f32 %v3427_v35 }
 0x9ac   :  { %v3436_v39 = vpop.xlane.xlu1 %3435 }
 0x9ad   :  { %6589 = vrcp.f32 %v3436_v39  ;;  %v3430_v61 = vpop.xlane.xlu0 %3429 }
 0x9ae   :  { %6591 = vrcp.f32 %v3430_v61 }
 0x9b0   :  { %v3439_v62 = vpop.xlane.xlu1 %3438 }
 0x9b1   :  { %6593 = vrcp.f32 %v3439_v62  ;;  %v6502_v63 = vpop.permute.xlu0 %6501 }
 0x9b2   :  { %v6504_v50 = vunpack.i.h.bf16 %v6502_v63  ;;  %v6503_v37 = vunpack.i.l.bf16 %v6502_v63 }
 0x9b3   :  { %v6586_v59 = vpop.eup %6585 }
 0x9b4   :  { %v6588_v0 = vpop.eup %6587  ;;  %v3449_v4 = vmul.f32 %v6586_v59, %v6574_v40  ;;  %v6410_v10 = vpack.c.bf16 %v6504_v50, %v6503_v37  ;;  %v3463_v11 = vpop.permute.xlu1 %3462 }
 0x9b5   :  { %6245 = vmatpush3.msk.msra.mxu0 %vm124_vm2, %v3463_v11  ;;  %v3447_v19 = vmul.f32 %v6588_v0, %v6576_v27  ;;  %v6507_v27 = vpop.permute.xlu0 %6506 }
 0x9b6   :  { %v7437_v20 = vadd.f32 %v3449_v4, %v2124_v1  ;;  %6411 = vmatpush3.bf16.msra.mxu1 %v6410_v10  ;;  %6270 = vmatprep.subr.mxu0 %v6623_v12  ;;  %v6509_v33 = vunpack.i.h.bf16 %v6507_v27  ;;  %v6508_v3 = vunpack.i.l.bf16 %v6507_v27 }
 0x9b7   :  { %v6590_v23 = vpop.eup %6589  ;;  %6259 = vmatprep.subr.mxu1 %v6623_v12  ;;  %v7441_v7 = vadd.f32 %v3447_v19, %v2122_v17 }
 0x9b8   :  { %v6592_v28 = vpop.eup %6591  ;;  %v3450_v25 = vmul.f32 %v6590_v23, %v6578_v51  ;;  %v6413_v49 = vpack.c.bf16 %v6509_v33, %v6508_v3 }
 0x9b9   :  { %v3448_v46 = vmul.f32 %v6592_v28, %v6580_v14  ;;  %v4214_v36 = vpop.permute.xlu0 %4213 }
 0x9ba   :  { %v7447_v2 = vadd.f32 %v3450_v25, %v2125_v32 }
 0x9bb   :  { %v6594_v22 = vpop.eup %6593  ;;  %v7449_v6 = vadd.f32 %v3448_v46, %v2123_v16 }
 0x9bc   :  { %v3451_v21 = vmul.f32 %v6594_v22, %v6582_v18  ;;  %v3886_v18 = vld [vmem:[%s7886_s4 + $0x10] sm:$0xff] }
 0x9bd   :  { %v4206_v52 = vpop.permute.xlu0 %4205 }
 0x9be   :  { %v7453_v40 = vadd.f32 %v3451_v21, %v2126_v29 }
 0x9e5   :  { %v3424_v26 = vpop.xlane.xlu1 %3423 }
 0x9e6   :  { %6595 = vrcp.f32 %v3424_v26 }
 0x9e9   :  { %v3562_v31 = vpop.permute.xlu1 %3561 }
 0x9ea   :  { %6260 = vmatpush3.msk.msra.mxu1 %vm124_vm2, %v3562_v31 }
 0x9eb   :  { %6262 = vmatmul.mubr.msk.f32.vlgmr.msra.gmra.mrb[44].mxu1 %vm1344_vm5, %v3449_v4  ;;  %6412 = vmatprep.subr.bf16.mxu1 %v6621_v8 }
 0x9ec   :  { %6264 = vmatprep.mubr.msk.f32.mxu1 %vm6622_vm0, %v6623_v12 }
 0x9ed   :  { %v7466_v13 = vpop.permute.xlu1 %6511 }
 0x9ee   :  { %v6513_v3 = vunpack.i.l.bf16 %v7466_v13 }
 0x9ef   :  { %6265 = vmatmul.mubr.msk.f32.gmra.mrb[46].mxu1 %vm1344_vm5, %v3450_v25  ;;  %v6514_v25 = vunpack.i.h.bf16 %v7466_v13 }
 0x9f0   :  { %v6596_v34 = vpop.eup %6595  ;;  %6267 = vmatprep.mubr.msk.f32.mxu1 %vm6622_vm0, %v6623_v12 }
 0x9f1   :  { %v3446_v47 = vmul.f32 %v6596_v34, %v7421_v57  ;;  %6415 = vmatpush3.bf16.xpose.msk.msra.mxu1 %vm6926_vm4, %v6413_v49  ;;  %v4204_v15 = vpop.permute.xlu1 %4203 }
 0x9f2   :  { %6291 = vmatprep.subr.mxu1 %v6623_v12 }
 0x9f3   :  { %v7471_v51 = vadd.f32 %v3446_v47, %v2121_v5  ;;  %6247 = vmatmul.mubr.msk.f32.vlgmr.msra.gmra.mrb[46].mxu0 %vm1344_vm5, %v3446_v47  ;;  %6268 = vmatmul.mubr.msk.f32.gmra.mrb[48].mxu1 %vm1344_vm5, %v3451_v21 }
 0x9f4   :  { %6249 = vmatprep.mubr.msk.f32.mxu0 %vm6622_vm0, %v6623_v12  ;;  %6293 = vmatprep.mubr.msk.f32.mxu1 %vm6622_vm0, %v6623_v12 }
 0x9f5   :  { %v7488_v14 = vpop.permute.xlu1 %4317  ;;  %6271 = vmatpush3.msra.mxu0 %v3886_v18 }
 0x9f6   :  { %6416 = vmatprep.subr.bf16.mxu0 %v6621_v8 }
 0x9f7   :  { %6250 = vmatmul.mubr.msk.f32.gmra.mrb[48].mxu0 %vm1344_vm5, %v3447_v19 }
 0x9f8   :  { %6252 = vmatprep.mubr.msk.f32.mxu0 %vm6622_vm0, %v6623_v12 }
 0x9f9   :  { %6292 = vmatpush3.xpose.msk.msra.mxu1 %vm1041_vm3, %v4214_v36  ;;  %v4208_v9 = vpop.permute.xlu1 %4207 }
 0x9fa   :  { %6420 = vmatprep.subr.bf16.mxu1 %v6621_v8 }
 0x9fb   :  { %6253 = vmatmul.mubr.msk.f32.gmra.mrb[50].mxu0 %vm1344_vm5, %v3448_v46 }
 0x9fc   :  { %6294 = vmatmul.mubr.msk.f32.vlgmr.msra.gmra.mrb[50].mxu1 %vm1041_vm3, %v4204_v15  ;;  %6272 = vmatprep.mubr.msk.f32.mxu0 %vm6622_vm0, %v6623_v12 }
 0x9fd   :  { %6296 = vmatprep.mubr.msk.f32.mxu1 %vm6622_vm0, %v6623_v12 }
 0xa00   :  { %6297 = vmatmul.mubr.msk.f32.gmra.mrb[52].mxu1 %vm1041_vm3, %v4206_v52 }
 0xa01   :  { %6299 = vmatprep.mubr.msk.f32.mxu1 %vm6622_vm0, %v6623_v12 }
 0xa04   :  { %6300 = vmatmul.mubr.msk.f32.gmra.mrb[54].mxu1 %vm1041_vm3, %v4208_v9 }
 0xa05   :  { %6323 = vmatprep.mubr.msk.f32.mxu1 %vm6622_vm0, %v6623_v12 }
 0xabe   :  { %v3642_v53 = vpop.f32.mrb[44].mxu1 }
 0xabf   :  { %v3774_v55 = vcombine.high %v3642_v53, %v3642_v53  ;;  %v3781_v57 = vrot.slane %v3642_v53, %v6733_v45  ;;  %v6263_v58 = vpop.f32.mrb[45].mxu1 }
 0xac1   :  { %v3788_v60 = vrot.slane %v3774_v55, %v6733_v45  ;;  %v3789_v35 = vcombine.high %v3781_v57, %v3781_v57  ;;  %v7505_v39 = vrot.slane %v3781_v57, %v6733_v45 }
 0xac2   :  { %v3647_v61 = vpop.f32.mrb[46].mxu1 }
 0xac3   :  { %v3790_v62 = vcombine.high %v3788_v60, %v3788_v60  ;;  %v3804_v63 = vrot.slane %v3788_v60, %v6733_v45  ;;  %v3811_v50 = vrot.slane %v3789_v35, %v6733_v45  ;;  %v3819_v37 = vcombine.high %v7505_v39, %v7505_v39  ;;  %v6266_v59 = vpop.f32.mrb[47].mxu1 }
 0xac4   :  { %v3823_v0 = vcombine.high %v3647_v61, %v3647_v61  ;;  %v3830_v1 = vrot.slane %v3647_v61, %v6733_v45 }
 0xac5   :  { %v3818_v4 = vrot.slane %v3790_v62, %v6733_v45  ;;  %v3820_v10 = vcombine.high %v3804_v63, %v3804_v63  ;;  %v3821_v11 = vcombine.high %v3811_v50, %v3811_v50  ;;  %v7516_v16 = vcombine.low %v3811_v50, %v3819_v37 }
 0xac6   :  { %v3837_v17 = vrot.slane %v3823_v0, %v6733_v45  ;;  %v3838_v19 = vcombine.high %v3830_v1, %v3830_v1  ;;  %v3846_v23 = vrot.slane %v3830_v1, %v6733_v45  ;;  %v3543_v28 = vpop.f32.mrb[46].mxu0  ;;  %v3652_v32 = vpop.f32.mrb[48].mxu1 }
 0xac7   :  { %v7518_v46 = vcombine.low %v3821_v11, %v3804_v63  ;;  %v3822_v22 = vcombine.high %v3818_v4, %v3818_v4  ;;  %v6248_v29 = vpop.f32.mrb[47].mxu0  ;;  %v6269_v21 = vpop.f32.mrb[49].mxu1  ;;  %v7523_v49 = vcombine.low %v3818_v4, %v3820_v10  ;;  %v3662_v5 = vcombine.high %v3543_v28, %v3543_v28 }
 0xac8   :  { %v3839_v26 = vcombine.high %v3837_v17, %v3837_v17  ;;  %v3853_v27 = vrot.slane %v3837_v17, %v6733_v45  ;;  %v3860_v31 = vrot.slane %v3838_v19, %v6733_v45  ;;  %v3868_v33 = vcombine.high %v3846_v23, %v3846_v23 }
 0xac9   :  { %v4034_v34 = vcombine.low %v3822_v22, %v3846_v23  ;;  %v3669_v53 = vrot.slane %v3543_v28, %v6733_v45  ;;  %v3676_v55 = vrot.slane %v3662_v5, %v6733_v45  ;;  %v3878_v57 = vrot.slane %v3652_v32, %v6733_v45 }
 0xaca   :  { %v3867_v47 = vrot.slane %v3839_v26, %v6733_v45  ;;  %v3869_v15 = vcombine.high %v3853_v27, %v3853_v27  ;;  %v3870_v36 = vcombine.high %v3860_v31, %v3860_v31  ;;  %v4035_v52 = vcombine.low %v3860_v31, %v3868_v33  ;;  %v3548_v9 = vpop.f32.mrb[48].mxu0 }
 0xacb   :  { %v4044_v18 = vrot.slane %v4034_v34, %v6733_v45  ;;  %v6251_v58 = vpop.f32.mrb[49].mxu0  ;;  %v4002_v60 = vrot.slane %v7516_v16, %v6733_v45  ;;  %v4009_v35 = vrot.slane %v7518_v46, %v6733_v45  ;;  %v3677_v37 = vcombine.high %v3669_v53, %v3669_v53 }
 0xacc   :  { %v4051_v61 = vrot.slane %v4035_v52, %v6733_v45  ;;  %v3871_v62 = vcombine.high %v3867_v47, %v3867_v47  ;;  %v4036_v63 = vcombine.low %v3870_v36, %v3853_v27  ;;  %v4037_v50 = vcombine.low %v3867_v47, %v3869_v15 }
 0xacd   :  { %v3678_v59 = vcombine.high %v3676_v55, %v3676_v55  ;;  %v3685_v1 = vrot.slane %v3669_v53, %v6733_v45  ;;  %v3692_v4 = vrot.slane %v3676_v55, %v6733_v45  ;;  %v3885_v10 = vrot.slane %v3878_v57, %v6733_v45 }
 0xace   :  { %v7535_v0 = vcombine.low %v4044_v18, %v4051_v61  ;;  %v3553_v11 = vpop.f32.mrb[50].mxu0  ;;  %v3699_v17 = vrot.slane %v3677_v37, %v6733_v45  ;;  %v3711_v23 = vcombine.high %v3548_v9, %v3548_v9  ;;  %v3718_v28 = vrot.slane %v3548_v9, %v6733_v45 }
 0xacf   :  { %v3706_v19 = vrot.slane %v3678_v59, %v6733_v45  ;;  %v6254_v32 = vpop.f32.mrb[51].mxu0  ;;  %v7543_v46 = vpop.f32.mrb[50].mxu1  ;;  %v4016_v22 = vrot.slane %v7523_v49, %v6733_v45  ;;  %v7547_v29 = vcombine.low %v3871_v62, %v3885_v10  ;;  %v3766_v21 = vrot.slane %v3553_v11, %v6733_v45 }
 0xad0   :  { %v6295_v26 = vpop.f32.mrb[51].mxu1  ;;  %v4411_v27 = vsel %vm1344_vm5, %v7543_v46, -inf  ;;  %v3887_v31 = vcombine.low %v3685_v1, %v3699_v17  ;;  %v5853_v33 = vcombine.high %v3685_v1, %v3699_v17  ;;  %v4058_v47 = vrot.slane %v4036_v63, %v6733_v45 }
 0xad1   :  { %v3889_v34 = vcombine.low %v3692_v4, %v3706_v19  ;;  %v5854_v5 = vcombine.high %v3692_v4, %v3706_v19  ;;  %4412 = vmax.xlane.f32.xlu0 %v4411_v27  ;;  %v4065_v15 = vrot.slane %v4037_v50, %v6733_v45  ;;  %v3725_v36 = vrot.slane %v3711_v23, %v6733_v45 }
 0xad2   :  { %v3726_v49 = vcombine.high %v3718_v28, %v3718_v28  ;;  %v3897_v52 = vrot.slane %v3887_v31, %v6733_v45  ;;  %v3904_v9 = vrot.slane %v5853_v33, %v6733_v45  ;;  %v3734_v58 = vrot.slane %v3718_v28, %v6733_v45 }
 0xad3   :  { %v3911_v18 = vrot.slane %v3889_v34, %v6733_v45  ;;  %v3918_v53 = vrot.slane %v5854_v5, %v6733_v45  ;;  %v7559_v55 = vpop.f32.mrb[52].mxu1  ;;  %v3727_v57 = vcombine.high %v3725_v36, %v3725_v36  ;;  %v3773_v62 = vrot.slane %v3766_v21, %v6733_v45 }
 0xad4   :  { %v3748_v61 = vrot.slane %v3726_v49, %v6733_v45  ;;  %v6298_v63 = vpop.f32.mrb[53].mxu1  ;;  %v3919_v50 = vcombine.low %v3897_v52, %v3904_v9  ;;  %v3741_v59 = vrot.slane %v3725_v36, %v6733_v45  ;;  %v4414_v1 = vsel %vm1344_vm5, %v7559_v55, -inf }
 0xad5   :  { %v3920_v37 = vcombine.low %v3911_v18, %v3918_v53  ;;  %v3755_v4 = vrot.slane %v3727_v57, %v6733_v45  ;;  %v3985_v17 = vcombine.low %v3773_v62, %v7505_v39  ;;  %4415 = vmax.xlane.f32.xlu1 %v4414_v1  ;;  %v4018_v32 = vcombine.low %v4009_v35, %v4016_v22 }
 0xad6   :  { %v3936_v10 = vcombine.low %v3734_v58, %v3748_v61  ;;  %v5855_v11 = vcombine.high %v3734_v58, %v3748_v61  ;;  %v3927_v19 = vrot.slane %v3919_v50, %v6733_v45  ;;  %v4067_v21 = vcombine.low %v4058_v47, %v4065_v15 }
 0xad7   :  { %v3934_v23 = vrot.slane %v3920_v37, %v6733_v45  ;;  %v7571_v28 = vpop.f32.mrb[54].mxu1  ;;  %v3938_v26 = vcombine.low %v3741_v59, %v3755_v4  ;;  %v5856_v27 = vcombine.high %v3741_v59, %v3755_v4  ;;  %v3995_v36 = vrot.slane %v3985_v17, %v6733_v45 }
 0xad8   :  { %v3946_v31 = vrot.slane %v3936_v10, %v6733_v45  ;;  %v3953_v33 = vrot.slane %v5855_v11, %v6733_v45  ;;  %v6301_v34 = vpop.f32.mrb[55].mxu1  ;;  %v4074_v39 = vrot.slane %v7535_v0, %v6733_v45  ;;  %v4081_v49 = vrot.slane %v4067_v21, %v6733_v45 }
 0xad9   :  { %v3935_v5 = vcombine.low %v3927_v19, %v3934_v23  ;;  %v6417_v35 = vpack.c.bf16 %v6514_v25, %v6513_v3  ;;  %v3960_v22 = vrot.slane %v3938_v26, %v6733_v45  ;;  %v3967_v47 = vrot.slane %v5856_v27, %v6733_v45 }
 0xada   :  { %v3968_v15 = vcombine.low %v3946_v31, %v3953_v33  ;;  %v4017_v52 = vcombine.low %v3995_v36, %v4002_v60  ;;  %v4082_v9 = vcombine.low %v4074_v39, %v4081_v49  ;;  %v4032_v3 = vrot.slane %v4018_v32, %v6733_v45 }
 0xadb   :  { %6273 = vmatmul.mubr.msk.f32.vlgmr.msra.gmra.mrb[52].mxu0 %vm1041_vm3, %v3935_v5  ;;  %v3969_v13 = vcombine.low %v3960_v22, %v3967_v47  ;;  %v4090_v48 = vrot.slane %v7547_v29, %v6733_v45  ;;  %v4312_v29 = vpop.permute.xlu1 %4311 }
 0xadc   :  { %6419 = vmatpush3.bf16.xpose.msk.msra.mxu0 %vm6926_vm4, %v6417_v35  ;;  %6275 = vmatprep.mubr.msk.f32.mxu0 %vm6622_vm0, %v6623_v12  ;;  %v4025_v25 = vrot.slane %v4017_v52, %v6733_v45  ;;  %v3976_v0 = vrot.slane %v3968_v15, %v6733_v45 }
 0xadd   :  { %6306 = vmatprep.subr.mxu0 %v6623_v12  ;;  %v3983_v16 = vrot.slane %v3969_v13, %v6733_v45  ;;  %v4097_v53 = vrot.slane %v4090_v48, %v6733_v45 }
 0xade   :  { %v4033_v60 = vcombine.low %v4025_v25, %v4032_v3 }
 0xadf   :  { %v3984_v18 = vcombine.low %v3976_v0, %v3983_v16 }
 0xae1   :  { %6276 = vmatmul.mubr.msk.f32.gmra.mrb[54].mxu0 %vm1041_vm3, %v3984_v18 }
 0xae2   :  { %6278 = vmatprep.mubr.msk.f32.mxu0 %vm6622_vm0, %v6623_v12 }
 0xae4   :  { %6307 = vmatpush3.xpose.msk.msra.mxu0 %vm1041_vm3, %v7488_v14  ;;  %v4308_v14 = vpop.permute.xlu0 %4307 }
 0xae5   :  { %6423 = vmatprep.subr.bf16.mxu0 %v6621_v8  ;;  %6279 = vmatmul.mubr.msk.f32.gmra.mrb[56].mxu0 %vm1041_vm3, %v4033_v60 }
 0xae6   :  { %6281 = vmatprep.mubr.msk.f32.mxu0 %vm6622_vm0, %v6623_v12 }
 0xae8   :  { %v4310_v8 = vpop.permute.xlu0 %4309 }
 0xae9   :  { %6282 = vmatmul.mubr.msk.f32.gmra.mrb[58].mxu0 %vm1041_vm3, %v4082_v9 }
 0xaea   :  { %6284 = vmatprep.mubr.msk.f32.mxu0 %vm6622_vm0, %v6623_v12 }
 0xaed   :  { %6285 = vmatmul.mubr.msk.f32.gmra.mrb[60].mxu0 %vm1041_vm3, %v4097_v53 }
 0xaee   :  { %6308 = vmatprep.mubr.msk.f32.mxu0 %vm6622_vm0, %v6623_v12 }
 0xaf1   :  { %6309 = vmatmul.mubr.msk.f32.vlgmr.msra.gmra.mrb[62].mxu0 %vm1041_vm3, %v4308_v14 }
 0xaf2   :  { %6311 = vmatprep.mubr.msk.f32.mxu0 %vm6622_vm0, %v6623_v12 }
 0xaf5   :  { %6312 = vmatmul.mubr.msk.f32.gmra.mrb[64].mxu0 %vm1041_vm3, %v4310_v8 }
 0xaf6   :  { %6314 = vmatprep.mubr.msk.f32.mxu0 %vm6622_vm0, %v6623_v12 }
 0xaf9   :  { %6315 = vmatmul.mubr.msk.f32.gmra.mrb[66].mxu0 %vm1041_vm3, %v4312_v29 }
 0xafa   :  { %6338 = vmatprep.mubr.msk.f32.mxu0 %vm6622_vm0, %v6623_v12 }
 0xb5e   :  { %v4413_v63 = vpop.xlane.xlu0 %4412 }
 0xb5f   :  { %v4429_v59 = vsub.f32 %v7543_v46, %v4413_v63 }
 0xb61   :  { %v4435_v17 = vmul.f32 1.442695, %v4429_v59 }
 0xb62   :  { %v4416_v4 = vpop.xlane.xlu1 %4415 }
 0xb63   :  { %v4430_v19 = vsub.f32 %v7559_v55, %v4416_v4  ;;  %6597 = vpow2.f32 %v4435_v17 }
 0xb6d   :  { %v6598_v5 = vpop.eup %6597 }
 0xb6e   :  { %v4447_v39 = vsel %vm1344_vm5, %v6598_v5, 0.0 }
 0xbae   :  { %v4174_v57 = vpop.f32.mrb[52].mxu0 }
 0xbaf   :  { %v7626_v58 = vadd.f32 %v4174_v57, %v7384_v44  ;;  %v6274_v61 = vpop.f32.mrb[53].mxu0 }
 0xbb4   :  { %v4179_v62 = vpop.f32.mrb[54].mxu0 }
 0xbb5   :  { %v7629_v50 = vadd.f32 %v4179_v62, %v7386_v24  ;;  %v6277_v37 = vpop.f32.mrb[55].mxu0  ;;  %v4437_v24 = vmul.f32 1.442695, %v4430_v19 }
 0xbb7   :  { %6599 = vpow2.f32 %v4437_v24 }
 0xbb8   :  { %v4184_v1 = vpop.f32.mrb[56].mxu0 }
 0xbb9   :  { %v7633_v10 = vadd.f32 %v4184_v1, %v7388_v56  ;;  %v6280_v11 = vpop.f32.mrb[57].mxu0 }
 0xbbc   :  { %v4189_v44 = vpop.f32.mrb[58].mxu0 }
 0xbbd   :  { %v7637_v23 = vadd.f32 %v4189_v44, %v7390_v38  ;;  %v6283_v32 = vpop.f32.mrb[59].mxu0  ;;  %v4417_v38 = vsel %vm1351_vm6, %v7571_v28, -inf }
 0xbc0   :  { %v4194_v21 = vpop.f32.mrb[60].mxu0 }
 0xbc1   :  { %v7640_v26 = vadd.f32 %v4194_v21, %v7392_v30  ;;  %v6286_v46 = vpop.f32.mrb[61].mxu0  ;;  %v6600_v35 = vpop.eup %6599 }
 0xbc2   :  { %v4450_v22 = vsel %vm1344_vm5, %v6600_v35, 0.0 }
 0xbc4   :  { %v4397_v27 = vpop.f32.mrb[62].mxu0 }
 0xbc5   :  { %v6310_v56 = vpop.f32.mrb[63].mxu0  ;;  %v4420_v31 = vsel %vm1344_vm5, %v4397_v27, -inf }
 0xbc6   :  { %4421 = vmax.xlane.f32.xlu0 %v4420_v31 }
 0xbc8   :  { %v4402_v33 = vpop.f32.mrb[64].mxu0 }
 0xbc9   :  { %v6313_v55 = vpop.f32.mrb[65].mxu0  ;;  %v4423_v34 = vsel %vm1344_vm5, %v4402_v33, -inf }
 0xbca   :  { %4418 = vmax.xlane.f32.xlu0 %v4417_v38  ;;  %4424 = vmax.xlane.f32.xlu1 %v4423_v34 }
 0xbcc   :  { %v4407_v36 = vpop.f32.mrb[66].mxu0 }
 0xbcd   :  { %v6316_v30 = vpop.f32.mrb[67].mxu0  ;;  %v4426_v49 = vsel %vm1351_vm6, %v4407_v36, -inf }
 0xbce   :  { %4448 = vadd.xlane.f32.xlu1 %v4447_v39  ;;  %4427 = vmax.xlane.f32.xlu0 %v4426_v49 }
 0xbd2   :  { %4451 = vadd.xlane.f32.xlu0 %v4450_v22 }
 0xbdf   :  { %4487 = vrot.lane.b32.xlu1 %v6866_v54, %s6635_s22 }
 0xc53   :  { %v4422_v47 = vpop.xlane.xlu0 %4421 }
 0xc54   :  { %v4432_v15 = vsub.f32 %v4397_v27, %v4422_v47 }
 0xc56   :  { %v4441_v52 = vmul.f32 1.442695, %v4432_v15 }
 0xc57   :  { %v4419_v9 = vpop.xlane.xlu0 %4418  ;;  %v4425_v13 = vpop.xlane.xlu1 %4424 }
 0xc58   :  { %6601 = vpow2.f32 %v4441_v52  ;;  %v4431_v25 = vsub.f32 %v7571_v28, %v4419_v9  ;;  %v4433_v3 = vsub.f32 %v4402_v33, %v4425_v13 }
 0xc5a   :  { %v4439_v0 = vmul.f32 1.442695, %v4431_v25  ;;  %v4443_v16 = vmul.f32 1.442695, %v4433_v3 }
 0xc5b   :  { %v4449_v60 = vpop.xlane.xlu1 %4448  ;;  %v4428_v18 = vpop.xlane.xlu0 %4427 }
 0xc5c   :  { %6603 = vpow2.f32 %v4439_v0  ;;  %v4434_v48 = vsub.f32 %v4407_v36, %v4428_v18 }
 0xc5d   :  { %6605 = vpow2.f32 %v4443_v16 }
 0xc5e   :  { %6607 = vrcp.f32 %v4449_v60  ;;  %v4445_v53 = vmul.f32 1.442695, %v4434_v48  ;;  %v5745_v48 = vld [vmem:[%s7887_s7 + $0x8] sm:$0x1] }
 0xc5f   :  { %v4452_v14 = vpop.xlane.xlu0 %4451 }
 0xc60   :  { %6609 = vpow2.f32 %v4445_v53 }
 0xc61   :  { %6611 = vrcp.f32 %v4452_v14 }
 0xc62   :  { %v6602_v54 = vpop.eup %6601 }
 0xc63   :  { %v4456_v8 = vsel %vm1344_vm5, %v6602_v54, 0.0 }
 0xc64   :  { %4457 = vadd.xlane.f32.xlu1 %v4456_v8 }
 0xc66   :  { %v6604_v29 = vpop.eup %6603 }
 0xc67   :  { %v6606_v57 = vpop.eup %6605  ;;  %v4453_v28 = vsel %vm1351_vm6, %v6604_v29, 0.0 }
 0xc68   :  { %v6608_v61 = vpop.eup %6607  ;;  %v4459_v62 = vsel %vm1344_vm5, %v6606_v57, 0.0  ;;  %4454 = vadd.xlane.f32.xlu0 %v4453_v28 }
 0xc69   :  { %v4471_v63 = vmul.f32 %v6608_v61, %v6598_v5  ;;  %4460 = vadd.xlane.f32.xlu1 %v4459_v62  ;;  %v5750_v61 = vld [vmem:[%s7887_s7 + $0x14] sm:$0x1] }
 0xc6a   :  { %v6610_v37 = vpop.eup %6609 }
 0xc6b   :  { %v6612_v59 = vpop.eup %6611  ;;  %v4462_v1 = vsel %vm1351_vm6, %v6610_v37, 0.0  ;;  %v4477_v4 = vadd.f32 %v4471_v63, %v7471_v51 }
 0xc6c   :  { %v4472_v11 = vmul.f32 %v6612_v59, %v6600_v35 }
 0xc6d   :  { %4463 = vadd.xlane.f32.xlu1 %v4462_v1  ;;  %v5699_v19 = vmul.f32 0.25, %v4477_v4 }
 0xc6e   :  { %v4478_v17 = vadd.f32 %v4472_v11, %v7441_v7  ;;  %v4488_v7 = vpop.permute.xlu1 %4487 }
 0xc70   :  { %v5700_v44 = vmul.f32 0.25, %v4478_v17 }
 0xc72   :  { %v5705_v32 = vpack.c.bf16 %v5700_v44, %v5699_v19 }
 0xc74   :  { %v5711_v24 = vsel %vm1344_vm5, %v5705_v32, 0 }
 0xc75   :  { %v5898_v21 = vcombine.low %v5711_v24, %v5711_v24  ;;  %v5899_v46 = vcombine.high %v5711_v24, %v5711_v24 }
 0xc77   :  { %5740 = vst [vmem:[%s7887_s7] sm:$0xf] %v5898_v21  ;;  %5741 = vst [vmem:[%s7887_s7 + $0x4] sm:$0xf] %v5899_v46 }
 0xc7e   :  { %4586 = vrot.lane.b32.xlu1 %v6918_v42, %s6635_s22  ;;  %6516 = vrot.lane.b32.xlu0 %v6881_v43, %s6635_s22 }
 0xc82   :  { %6521 = vrot.lane.b32.xlu0 %v6913_v41, %s6635_s22 }
 0xcf1   :  { %v4458_v51 = vpop.xlane.xlu1 %4457 }
 0xcf2   :  { %6613 = vrcp.f32 %v4458_v51 }
 0xcf5   :  { %v4455_v27 = vpop.xlane.xlu0 %4454 }
 0xcf6   :  { %v4461_v56 = vpop.xlane.xlu1 %4460  ;;  %6615 = vrcp.f32 %v4455_v27 }
 0xcf7   :  { %6617 = vrcp.f32 %v4461_v56 }
 0xcf9   :  { %v6517_v31 = vpop.permute.xlu0 %6516 }
 0xcfa   :  { %v4464_v33 = vpop.xlane.xlu1 %4463  ;;  %v6519_v55 = vunpack.i.h.bf16 %v6517_v31  ;;  %v6518_v38 = vunpack.i.l.bf16 %v6517_v31 }
 0xcfb   :  { %6619 = vrcp.f32 %v4464_v33 }
 0xcfc   :  { %v6614_v34 = vpop.eup %6613  ;;  %v6421_v42 = vpack.c.bf16 %v6519_v55, %v6518_v38 }
 0xcfd   :  { %v6522_v5 = vpop.permute.xlu0 %6521  ;;  %v4474_v36 = vmul.f32 %v6614_v34, %v6602_v54 }
 0xcfe   :  { %v6524_v43 = vunpack.i.h.bf16 %v6522_v5  ;;  %v6523_v30 = vunpack.i.l.bf16 %v6522_v5  ;;  %6422 = vmatpush3.bf16.msra.mxu1 %v6421_v42  ;;  %v4587_v13 = vpop.permute.xlu1 %4586 }
 0xcff   :  { %6321 = vmatprep.subr.mxu1 %v6623_v12  ;;  %v4480_v22 = vadd.f32 %v4474_v36, %v7437_v20 }
 0xd00   :  { %v6616_v41 = vpop.eup %6615  ;;  %v6424_v39 = vpack.c.bf16 %v6524_v43, %v6523_v30 }
 0xd01   :  { %v6618_v49 = vpop.eup %6617  ;;  %v4473_v35 = vmul.f32 %v6616_v41, %v6604_v29  ;;  %v5702_v25 = vmul.f32 0.25, %v4480_v22 }
 0xd02   :  { %6322 = vmatpush3.msk.msra.mxu1 %vm124_vm2, %v4488_v7  ;;  %6425 = vmatpush3.bf16.msra.mxu0 %v6424_v39  ;;  %v4475_v47 = vmul.f32 %v6618_v49, %v6606_v57 }
 0xd03   :  { %6324 = vmatmul.mubr.msk.f32.vlgmr.msra.gmra.mrb[56].mxu1 %vm1344_vm5, %v4471_v63  ;;  %6336 = vmatprep.subr.mxu0 %v6623_v12  ;;  %v4479_v15 = vadd.f32 %v4473_v35, %v7449_v6 }
 0xd04   :  { %6326 = vmatprep.mubr.msk.f32.mxu1 %vm6622_vm0, %v6623_v12  ;;  %v4481_v52 = vadd.f32 %v4475_v47, %v7447_v2  ;;  %6347 = vmatprep.subr.mxu1 %v6623_v12 }
 0xd05   :  { %v6620_v9 = vpop.eup %6619  ;;  %v5701_v20 = vmul.f32 0.25, %v4479_v15 }
 0xd06   :  { %6337 = vmatpush3.msk.msra.mxu0 %vm124_vm2, %v4587_v13  ;;  %v5703_v3 = vmul.f32 0.25, %v4481_v52  ;;  %v4476_v0 = vmul.f32 %v6620_v9, %v6610_v37  ;;  %v4911_v37 = vld [vmem:[%s7886_s4 + $0x18] sm:$0xff] }
 0xd07   :  { %6327 = vmatmul.mubr.msk.f32.gmra.mrb[58].mxu1 %vm1344_vm5, %v4472_v11  ;;  %6339 = vmatmul.mubr.msk.f32.vlgmr.msra.gmra.mrb[68].mxu0 %vm1344_vm5, %v4474_v36  ;;  %v5706_v6 = vpack.c.bf16 %v5701_v20, %v5701_v20 }
 0xd08   :  { %6329 = vmatprep.mubr.msk.f32.mxu1 %vm6622_vm0, %v6623_v12  ;;  %6341 = vmatprep.mubr.msk.f32.mxu0 %vm6622_vm0, %v6623_v12  ;;  %v5707_v2 = vpack.c.bf16 %v5703_v3, %v5702_v25  ;;  %v4482_v16 = vadd.f32 %v4476_v0, %v7453_v40 }
 0xd09   :  { %v5713_v60 = vsel %vm1344_vm5, %v5706_v6, 0  ;;  %6348 = vmatpush3.msra.mxu1 %v4911_v37 }
 0xd0a   :  { %v5900_v53 = vcombine.low %v5713_v60, %v5713_v60  ;;  %v5715_v14 = vsel %vm1344_vm5, %v5707_v2, 0  ;;  %v5704_v54 = vmul.f32 0.25, %v4482_v16 }
 0xd0b   :  { %6330 = vmatmul.mubr.msk.f32.gmra.mrb[60].mxu1 %vm1344_vm5, %v4473_v35  ;;  %6342 = vmatmul.mubr.msk.f32.gmra.mrb[70].mxu0 %vm1344_vm5, %v4475_v47  ;;  %v5901_v40 = vcombine.low %v5715_v14, %v5715_v14  ;;  %v5902_v8 = vcombine.high %v5715_v14, %v5715_v14 }
 0xd0c   :  { %v5746_v29 = vsel %vm7691_vm8, %v5900_v53, %v5745_v48  ;;  %6344 = vmatprep.mubr.msk.f32.mxu0 %vm6622_vm0, %v6623_v12  ;;  %v5708_v57 = vpack.c.bf16 %v5704_v54, %v5704_v54  ;;  %6349 = vmatprep.mubr.msk.f32.mxu1 %vm6622_vm0, %v6623_v12 }
 0xd0d   :  { %5747 = vst [vmem:[%s7887_s7 + $0x8] sm:$0x1] %v5746_v29  ;;  %5748 = vst [vmem:[%s7887_s7 + $0xc] sm:$0xf] %v5901_v40 }
 0xd0e   :  { %5749 = vst [vmem:[%s7887_s7 + $0x10] sm:$0xf] %v5902_v8  ;;  %v5717_v28 = vsel %vm1344_vm5, %v5708_v57, 0 }
 0xd0f   :  { %6345 = vmatmul.mubr.msk.f32.gmra.mrb[72].mxu0 %vm1344_vm5, %v4476_v0  ;;  %v5903_v62 = vcombine.low %v5717_v28, %v5717_v28 }
 0xd11   :  { %v5751_v63 = vsel %vm7691_vm8, %v5903_v62, %v5750_v61 }
 0xd12   :  { %5752 = vst [vmem:[%s7887_s7 + $0x14] sm:$0x1] %v5751_v63 }
 0xdd6   :  { %v4568_v59 = vpop.f32.mrb[56].mxu1 }
 0xdd7   :  { %v4687_v1 = vcombine.high %v4568_v59, %v4568_v59  ;;  %v4694_v4 = vrot.slane %v4568_v59, %v6733_v45  ;;  %v6325_v11 = vpop.f32.mrb[57].mxu1 }
 0xdd9   :  { %v4701_v17 = vrot.slane %v4687_v1, %v6733_v45  ;;  %v4702_v19 = vcombine.high %v4694_v4, %v4694_v4  ;;  %v4710_v21 = vrot.slane %v4694_v4, %v6733_v45 }
 0xdda   :  { %v4573_v44 = vpop.f32.mrb[58].mxu1  ;;  %v4667_v32 = vpop.f32.mrb[68].mxu0 }
 0xddb   :  { %v4703_v24 = vcombine.high %v4701_v17, %v4701_v17  ;;  %v4724_v46 = vrot.slane %v4702_v19, %v6733_v45  ;;  %v4736_v7 = vcombine.high %v4573_v44, %v4573_v44  ;;  %v6328_v51 = vpop.f32.mrb[59].mxu1  ;;  %v6340_v27 = vpop.f32.mrb[69].mxu0  ;;  %v4717_v56 = vrot.slane %v4701_v17, %v6733_v45 }
 0xddc   :  { %v4743_v31 = vrot.slane %v4573_v44, %v6733_v45  ;;  %v4799_v33 = vcombine.high %v4667_v32, %v4667_v32  ;;  %v4806_v55 = vrot.slane %v4667_v32, %v6733_v45 }
 0xddd   :  { %v4731_v38 = vrot.slane %v4703_v24, %v6733_v45  ;;  %v4912_v34 = vcombine.low %v4710_v21, %v4724_v46  ;;  %v5882_v42 = vcombine.high %v4710_v21, %v4724_v46  ;;  %v4750_v5 = vrot.slane %v4736_v7, %v6733_v45 }
 0xdde   :  { %v4751_v36 = vcombine.high %v4743_v31, %v4743_v31  ;;  %v4759_v43 = vrot.slane %v4743_v31, %v6733_v45  ;;  %v4813_v30 = vrot.slane %v4799_v33, %v6733_v45  ;;  %v4814_v41 = vcombine.high %v4806_v55, %v4806_v55  ;;  %v4578_v39 = vpop.f32.mrb[60].mxu1  ;;  %v4672_v49 = vpop.f32.mrb[70].mxu0 }
 0xddf   :  { %v4914_v35 = vcombine.low %v4717_v56, %v4731_v38  ;;  %v5883_v22 = vcombine.high %v4717_v56, %v4731_v38  ;;  %v4922_v47 = vrot.slane %v4912_v34, %v6733_v45  ;;  %v4929_v15 = vrot.slane %v5882_v42, %v6733_v45  ;;  %v6331_v52 = vpop.f32.mrb[61].mxu1  ;;  %v6343_v9 = vpop.f32.mrb[71].mxu0 }
 0xde0   :  { %v4752_v13 = vcombine.high %v4750_v5, %v4750_v5  ;;  %v4766_v20 = vrot.slane %v4750_v5, %v6733_v45  ;;  %v4773_v25 = vrot.slane %v4751_v36, %v6733_v45  ;;  %v4815_v3 = vcombine.high %v4813_v30, %v4813_v30 }
 0xde1   :  { %v4936_v0 = vrot.slane %v4914_v35, %v6733_v45  ;;  %v4943_v6 = vrot.slane %v5883_v22, %v6733_v45  ;;  %v4944_v2 = vcombine.low %v4922_v47, %v4929_v15  ;;  %v4822_v16 = vrot.slane %v4806_v55, %v6733_v45 }
 0xde2   :  { %v4780_v60 = vrot.slane %v4752_v13, %v6733_v45  ;;  %v4961_v18 = vcombine.low %v4759_v43, %v4773_v25  ;;  %v5884_v48 = vcombine.high %v4759_v43, %v4773_v25  ;;  %v4829_v53 = vrot.slane %v4813_v30, %v6733_v45  ;;  %v4677_v14 = vpop.f32.mrb[72].mxu0 }
 0xde3   :  { %v4945_v54 = vcombine.low %v4936_v0, %v4943_v6  ;;  %v4952_v40 = vrot.slane %v4944_v2, %v6733_v45  ;;  %v4836_v8 = vrot.slane %v4814_v41, %v6733_v45  ;;  %v4843_v29 = vrot.slane %v4815_v3, %v6733_v45  ;;  %v6346_v57 = vpop.f32.mrb[73].mxu0 }
 0xde4   :  { %v4963_v28 = vcombine.low %v4766_v20, %v4780_v60  ;;  %v5885_v61 = vcombine.high %v4766_v20, %v4780_v60  ;;  %v4971_v62 = vrot.slane %v4961_v18, %v6733_v45  ;;  %v4978_v63 = vrot.slane %v5884_v48, %v6733_v45 }
 0xde5   :  { %v4959_v37 = vrot.slane %v4945_v54, %v6733_v45  ;;  %v4844_v59 = vcombine.high %v4822_v16, %v4822_v16  ;;  %v4845_v1 = vcombine.high %v4829_v53, %v4829_v53  ;;  %v4846_v4 = vcombine.high %v4836_v8, %v4836_v8 }
 0xde6   :  { %v4985_v11 = vrot.slane %v4963_v28, %v6733_v45  ;;  %v4992_v17 = vrot.slane %v5885_v61, %v6733_v45  ;;  %v4993_v19 = vcombine.low %v4971_v62, %v4978_v63  ;;  %v4791_v44 = vrot.slane %v4578_v39, %v6733_v45 }
 0xde7   :  { %v4960_v32 = vcombine.low %v4952_v40, %v4959_v37  ;;  %v5011_v24 = vcombine.low %v4836_v8, %v4844_v59  ;;  %v5012_v21 = vcombine.low %v4846_v4, %v4829_v53  ;;  %v5013_v46 = vcombine.low %v4843_v29, %v4845_v1  ;;  %v7799_v4 = vld [vmem:[%s7888_s5] ss:$0 sm:$0xff] }
 0xde8   :  { %v4798_v7 = vrot.slane %v4791_v44, %v6733_v45  ;;  %v4848_v51 = vcombine.high %v4672_v49, %v4672_v49  ;;  %v4855_v27 = vrot.slane %v4672_v49, %v6733_v45  ;;  %v4847_v55 = vcombine.high %v4843_v29, %v4843_v29 }
 0xde9   :  { %v5027_v56 = vrot.slane %v5011_v24, %v6733_v45  ;;  %v5034_v31 = vrot.slane %v5012_v21, %v6733_v45  ;;  %v5041_v33 = vrot.slane %v5013_v46, %v6733_v45  ;;  %6350 = vmatmul.mubr.msk.f32.vlgmr.msra.gmra.mrb[62].mxu1 %vm1041_vm3, %v4960_v32  ;;  %v4903_v36 = vrot.slane %v4677_v14, %v6733_v45 }
 0xdea   :  { %v5010_v38 = vcombine.low %v4798_v7, %v4822_v16  ;;  %v4862_v34 = vrot.slane %v4848_v51, %v6733_v45  ;;  %v4863_v42 = vcombine.high %v4855_v27, %v4855_v27  ;;  %v4871_v5 = vrot.slane %v4855_v27, %v6733_v45  ;;  %6352 = vmatprep.mubr.msk.f32.mxu1 %vm6622_vm0, %v6623_v12 }
 0xdeb   :  { %v4994_v43 = vcombine.low %v4985_v11, %v4992_v17  ;;  %v5001_v30 = vrot.slane %v4993_v19, %v6733_v45  ;;  %v5043_v41 = vcombine.low %v5034_v31, %v5041_v33  ;;  %v4910_v2 = vrot.slane %v4903_v36, %v6733_v45 }
 0xdec   :  { %v5020_v39 = vrot.slane %v5010_v38, %v6733_v45  ;;  %v4864_v49 = vcombine.high %v4862_v34, %v4862_v34  ;;  %v4878_v35 = vrot.slane %v4862_v34, %v6733_v45  ;;  %v4885_v22 = vrot.slane %v4863_v42, %v6733_v45 }
 0xded   :  { %v4893_v47 = vcombine.high %v4871_v5, %v4871_v5  ;;  %v5059_v15 = vcombine.low %v4847_v55, %v4871_v5  ;;  %v5008_v52 = vrot.slane %v4994_v43, %v6733_v45  ;;  %v5057_v9 = vrot.slane %v5043_v41, %v6733_v45 }
 0xdee   :  { %v5042_v13 = vcombine.low %v5020_v39, %v5027_v56  ;;  %v4892_v20 = vrot.slane %v4864_v49, %v6733_v45  ;;  %v4894_v25 = vcombine.high %v4878_v35, %v4878_v35  ;;  %v4895_v3 = vcombine.high %v4885_v22, %v4885_v22 }
 0xdef   :  { %v5060_v0 = vcombine.low %v4885_v22, %v4893_v47  ;;  %v5069_v6 = vrot.slane %v5059_v15, %v6733_v45  ;;  %v5009_v16 = vcombine.low %v5001_v30, %v5008_v52 }
 0xdf0   :  { %v5061_v60 = vcombine.low %v4895_v3, %v4878_v35  ;;  %v5062_v18 = vcombine.low %v4892_v20, %v4894_v25  ;;  %v4896_v48 = vcombine.high %v4892_v20, %v4892_v20  ;;  %v5050_v53 = vrot.slane %v5042_v13, %v6733_v45 }
 0xdf1   :  { %v5076_v14 = vrot.slane %v5060_v0, %v6733_v45  ;;  %6353 = vmatmul.mubr.msk.f32.gmra.mrb[64].mxu1 %vm1041_vm3, %v5009_v16 }
 0xdf2   :  { %v5083_v54 = vrot.slane %v5061_v60, %v6733_v45  ;;  %v5090_v40 = vrot.slane %v5062_v18, %v6733_v45  ;;  %v5108_v8 = vcombine.low %v4896_v48, %v4910_v2  ;;  %6355 = vmatprep.mubr.msk.f32.mxu1 %vm6622_vm0, %v6623_v12  ;;  %v5058_v29 = vcombine.low %v5050_v53, %v5057_v9 }
 0xdf3   :  { %v5091_v57 = vcombine.low %v5069_v6, %v5076_v14 }
 0xdf4   :  { %v5092_v28 = vcombine.low %v5083_v54, %v5090_v40  ;;  %v5115_v63 = vrot.slane %v5108_v8, %v6733_v45 }
 0xdf5   :  { %6356 = vmatmul.mubr.msk.f32.gmra.mrb[66].mxu1 %vm1041_vm3, %v5058_v29  ;;  %v5099_v61 = vrot.slane %v5091_v57, %v6733_v45 }
 0xdf6   :  { %6358 = vmatprep.mubr.msk.f32.mxu1 %vm6622_vm0, %v6623_v12  ;;  %v5106_v62 = vrot.slane %v5092_v28, %v6733_v45  ;;  %v5122_v59 = vrot.slane %v5115_v63, %v6733_v45 }
 0xdf8   :  { %v5107_v37 = vcombine.low %v5099_v61, %v5106_v62 }
 0xdfa   :  { %6359 = vmatmul.mubr.msk.f32.gmra.mrb[68].mxu1 %vm1041_vm3, %v5107_v37 }
 0xdfb   :  { %6361 = vmatprep.mubr.msk.f32.mxu1 %vm6622_vm0, %v6623_v12 }
 0xdfe   :  { %6362 = vmatmul.mubr.msk.f32.gmra.mrb[70].mxu1 %vm1041_vm3, %v5122_v59 }
 0xebc   :  { %v5199_v1 = vpop.f32.mrb[62].mxu1 }
 0xebd   :  { %v5223_v11 = vadd.f32 %v5199_v1, %v7626_v58  ;;  %v6351_v17 = vpop.f32.mrb[63].mxu1 }
 0xebf   :  { %v5235_v19 = vadd.f32 %v7799_v4, %v5223_v11 }
 0xec1   :  { %v5245_v44 = vcombine.high %v5235_v19, %v5235_v19  ;;  %v5252_v32 = vrot.slane %v5235_v19, %v6733_v45 }
 0xec3   :  { %v5259_v12 = vrot.slane %v5245_v44, %v6733_v45  ;;  %v5260_v24 = vcombine.high %v5252_v32, %v5252_v32  ;;  %v5268_v7 = vrot.slane %v5252_v32, %v6733_v45 }
 0xec4   :  { %v5204_v21 = vpop.f32.mrb[64].mxu1 }
 0xec5   :  { %v5261_v46 = vcombine.high %v5259_v12, %v5259_v12  ;;  %v5282_v51 = vrot.slane %v5260_v24, %v6733_v45  ;;  %v5224_v27 = vadd.f32 %v5204_v21, %v7629_v50  ;;  %v6354_v56 = vpop.f32.mrb[65].mxu1  ;;  %v5275_v58 = vrot.slane %v5259_v12, %v6733_v45 }
 0xec7   :  { %v5289_v31 = vrot.slane %v5261_v46, %v6733_v45  ;;  %v5463_v33 = vcombine.low %v5268_v7, %v5282_v51  ;;  %v5892_v55 = vcombine.high %v5268_v7, %v5282_v51  ;;  %v5236_v38 = vadd.f32 %v7799_v4, %v5224_v27 }
 0xec8   :  { %v5209_v34 = vpop.f32.mrb[66].mxu1 }
 0xec9   :  { %v5465_v42 = vcombine.low %v5275_v58, %v5289_v31  ;;  %v5893_v5 = vcombine.high %v5275_v58, %v5289_v31  ;;  %v5473_v36 = vrot.slane %v5463_v33, %v6733_v45  ;;  %v5480_v43 = vrot.slane %v5892_v55, %v6733_v45  ;;  %v6357_v30 = vpop.f32.mrb[67].mxu1 }
 0xeca   :  { %v5294_v41 = vcombine.high %v5236_v38, %v5236_v38  ;;  %v5301_v50 = vrot.slane %v5236_v38, %v6733_v45  ;;  %v5225_v39 = vadd.f32 %v5209_v34, %v7633_v10 }
 0xecb   :  { %v5487_v49 = vrot.slane %v5465_v42, %v6733_v45  ;;  %v5494_v35 = vrot.slane %v5893_v5, %v6733_v45  ;;  %v5495_v22 = vcombine.low %v5473_v36, %v5480_v43 }
 0xecc   :  { %v5308_v47 = vrot.slane %v5294_v41, %v6733_v45  ;;  %v5309_v15 = vcombine.high %v5301_v50, %v5301_v50  ;;  %v5237_v52 = vadd.f32 %v7799_v4, %v5225_v39  ;;  %v5317_v13 = vrot.slane %v5301_v50, %v6733_v45 }
 0xecd   :  { %v5496_v9 = vcombine.low %v5487_v49, %v5494_v35  ;;  %v5214_v20 = vpop.f32.mrb[68].mxu1  ;;  %v5503_v25 = vrot.slane %v5495_v22, %v6733_v45 }
 0xece   :  { %v5310_v3 = vcombine.high %v5308_v47, %v5308_v47  ;;  %v5331_v0 = vrot.slane %v5309_v15, %v6733_v45  ;;  %v5343_v10 = vcombine.high %v5237_v52, %v5237_v52  ;;  %v6360_v6 = vpop.f32.mrb[69].mxu1  ;;  %v5324_v16 = vrot.slane %v5308_v47, %v6733_v45 }
 0xecf   :  { %v5510_v2 = vrot.slane %v5496_v9, %v6733_v45  ;;  %v5350_v60 = vrot.slane %v5237_v52, %v6733_v45  ;;  %v5226_v18 = vadd.f32 %v5214_v20, %v7637_v23 }
 0xed0   :  { %v5338_v48 = vrot.slane %v5310_v3, %v6733_v45  ;;  %v5512_v53 = vcombine.low %v5317_v13, %v5331_v0  ;;  %v5894_v14 = vcombine.high %v5317_v13, %v5331_v0  ;;  %v5357_v54 = vrot.slane %v5343_v10, %v6733_v45 }
 0xed1   :  { %v5511_v40 = vcombine.low %v5503_v25, %v5510_v2  ;;  %v5358_v8 = vcombine.high %v5350_v60, %v5350_v60  ;;  %v5366_v29 = vrot.slane %v5350_v60, %v6733_v45  ;;  %v5238_v57 = vadd.f32 %v7799_v4, %v5226_v18  ;;  %v5219_v28 = vpop.f32.mrb[70].mxu1 }
 0xed2   :  { %v5514_v61 = vcombine.low %v5324_v16, %v5338_v48  ;;  %v5895_v62 = vcombine.high %v5324_v16, %v5338_v48  ;;  %v5522_v63 = vrot.slane %v5512_v53, %v6733_v45  ;;  %v5529_v37 = vrot.slane %v5894_v14, %v6733_v45  ;;  %v6363_v23 = vpop.f32.mrb[71].mxu1 }
 0xed3   :  { %5693 = vst [vmem:[%s7889_s6] sm:$0xff] %v5511_v40  ;;  %v5359_v59 = vcombine.high %v5357_v54, %v5357_v54  ;;  %v5373_v1 = vrot.slane %v5357_v54, %v6733_v45  ;;  %v5380_v11 = vrot.slane %v5358_v8, %v6733_v45  ;;  %v5388_v17 = vcombine.high %v5366_v29, %v5366_v29 }
 0xed4   :  { %v5536_v19 = vrot.slane %v5514_v61, %v6733_v45  ;;  %v5543_v44 = vrot.slane %v5895_v62, %v6733_v45  ;;  %v5544_v32 = vcombine.low %v5522_v63, %v5529_v37  ;;  %v5567_v12 = vrot.slane %v5366_v29, %v6733_v45 }
 0xed5   :  { %v5387_v24 = vrot.slane %v5359_v59, %v6733_v45  ;;  %v5389_v21 = vcombine.high %v5373_v1, %v5373_v1  ;;  %v5390_v46 = vcombine.high %v5380_v11, %v5380_v11  ;;  %v5575_v7 = vcombine.low %v5380_v11, %v5388_v17 }
 0xed6   :  { %v5545_v51 = vcombine.low %v5536_v19, %v5543_v44  ;;  %5896 = vst.sshfl [vmem:[%s7889_s6 + $0x10] sm:$0x1 pattern:$0x73625140] %v5567_v12  ;;  %v5392_v27 = vcombine.high %v5238_v57, %v5238_v57  ;;  %v5399_v56 = vrot.slane %v5238_v57, %v6733_v45  ;;  %v5552_v58 = vrot.slane %v5544_v32, %v6733_v45 }
 0xed7   :  { %v5576_v31 = vcombine.low %v5390_v46, %v5373_v1  ;;  %v5391_v33 = vcombine.high %v5387_v24, %v5387_v24  ;;  %v5577_v5 = vcombine.low %v5387_v24, %v5389_v21  ;;  %v5585_v36 = vrot.slane %v5575_v7, %v6733_v45 }
 0xed8   :  { %v5559_v55 = vrot.slane %v5545_v51, %v6733_v45  ;;  %v5406_v38 = vrot.slane %v5392_v27, %v6733_v45  ;;  %v5407_v34 = vcombine.high %v5399_v56, %v5399_v56  ;;  %v5415_v42 = vrot.slane %v5399_v56, %v6733_v45 }
 0xed9   :  { %v5592_v43 = vrot.slane %v5576_v31, %v6733_v45  ;;  %v5227_v30 = vadd.f32 %v5219_v28, %v7640_v26  ;;  %v5599_v26 = vrot.slane %v5577_v5, %v6733_v45 }
 0xeda   :  { %v5560_v41 = vcombine.low %v5552_v58, %v5559_v55  ;;  %v5408_v50 = vcombine.high %v5406_v38, %v5406_v38  ;;  %v5422_v39 = vrot.slane %v5406_v38, %v6733_v45  ;;  %v5429_v49 = vrot.slane %v5407_v34, %v6733_v45 }
 0xedb   :  { %v5437_v35 = vcombine.high %v5415_v42, %v5415_v42  ;;  %v5578_v22 = vcombine.low %v5391_v33, %v5415_v42  ;;  %v5239_v47 = vadd.f32 %v7799_v4, %v5227_v30  ;;  %v5607_v15 = vcombine.low %v5585_v36, %v5592_v43 }
 0xedc   :  { %5694 = vst [vmem:[%s7889_s6 + $0x8] sm:$0xff] %v5560_v41  ;;  %v5436_v52 = vrot.slane %v5408_v50, %v6733_v45  ;;  %v5438_v9 = vcombine.high %v5422_v39, %v5422_v39  ;;  %v5439_v13 = vcombine.high %v5429_v49, %v5429_v49 }
 0xedd   :  { %v5606_v20 = vrot.slane %v5578_v22, %v6733_v45  ;;  %v5624_v25 = vcombine.low %v5429_v49, %v5437_v35  ;;  %v5447_v3 = vrot.slane %v5239_v47, %v6733_v45  ;;  %v5615_v60 = vrot.slane %v5607_v15, %v6733_v45 }
 0xede   :  { %v5625_v0 = vcombine.low %v5439_v13, %v5422_v39  ;;  %v5626_v10 = vcombine.low %v5436_v52, %v5438_v9  ;;  %v5440_v6 = vcombine.high %v5436_v52, %v5436_v52 }
 0xedf   :  { %v5608_v4 = vcombine.low %v5599_v26, %v5606_v20  ;;  %v5448_v2 = vcombine.high %v5447_v3, %v5447_v3  ;;  %v5455_v16 = vrot.slane %v5447_v3, %v6733_v45  ;;  %v5634_v53 = vrot.slane %v5624_v25, %v6733_v45 }
 0xee0   :  { %v5641_v18 = vrot.slane %v5625_v0, %v6733_v45  ;;  %v5648_v40 = vrot.slane %v5626_v10, %v6733_v45 }
 0xee1   :  { %v5622_v48 = vrot.slane %v5608_v4, %v6733_v45  ;;  %v5462_v14 = vrot.slane %v5448_v2, %v6733_v45  ;;  %v5627_v54 = vcombine.low %v5440_v6, %v5455_v16 }
 0xee2   :  { %v5656_v29 = vcombine.low %v5634_v53, %v5641_v18 }
 0xee3   :  { %v5623_v8 = vcombine.low %v5615_v60, %v5622_v48  ;;  %v5655_v57 = vrot.slane %v5627_v54, %v6733_v45  ;;  %v5679_v28 = vrot.slane %v5462_v14, %v6733_v45 }
 0xee4   :  { %v5664_v62 = vrot.slane %v5656_v29, %v6733_v45 }
 0xee5   :  { %5696 = vst [vmem:[%s7889_s6 + $0x18] sm:$0xff] %v5623_v8  ;;  %v5657_v61 = vcombine.low %v5648_v40, %v5655_v57  ;;  %5897 = vst.sshfl [vmem:[%s7889_s6 + $0x28] sm:$0x1 pattern:$0x73625140] %v5679_v28 }
 0xee7   :  { %v5671_v63 = vrot.slane %v5657_v61, %v6733_v45 }
 0xee9   :  { %v5672_v37 = vcombine.low %v5664_v62, %v5671_v63 }
 0xeeb   :  { %5697 = vst [vmem:[%s7889_s6 + $0x20] sm:$0xff] %v5672_v37 }

</bundles_post_ra>
